<compile_context>
chip_gen: v7x
topology: tpu7x:2x2x1
jax: 0.10.0
libtpu: 0.0.40
codegen_flags: <defaults>
</compile_context>

<pallas_src>
import jax
import jax.numpy as jnp
from jax.experimental import pallas as pl
from jax.experimental.pallas import tpu as pltpu


# ----------------------------- Pallas kernel ------------------------------ #
def gcn_forward_kernel(adj_ref, pool_ref, x_ref, w1_ref, w23_ref, wlin_ref,
                       vec_ref, blin_ref, out_ref):
    f32 = jnp.float32
    bf16 = jnp.bfloat16

    adj = adj_ref[...]          # [N, N]  bf16 normalized adjacency
    vec = vec_ref[...]          # [12, H] f32 packed small parameters

    b1, g1w, g1b, g1a = vec[0:1], vec[1:2], vec[2:3], vec[3:4]
    b2, g2w, g2b, g2a = vec[4:5], vec[5:6], vec[6:7], vec[7:8]
    b3, g3w, g3b, g3a = vec[8:9], vec[9:10], vec[10:11], vec[11:12]

    def graph_norm(h, w, b, alpha, eps=1e-5):
        # GraphNorm with batch=None: normalize over all nodes per feature (f32 math)
        mean = jnp.mean(h, axis=0, keepdims=True)
        centered = h - alpha * mean
        var = jnp.mean(centered * centered, axis=0, keepdims=True)
        return w * centered * jax.lax.rsqrt(var + eps) + b

    # ---- layer 1: reordered (A @ X) @ W1 since in_channels < hidden ----
    ax = jnp.dot(adj, x_ref[...], preferred_element_type=f32)                 # [N, Cin]
    h = jnp.dot(ax.astype(bf16), w1_ref[...], preferred_element_type=f32) + b1
    h = jnp.maximum(graph_norm(h, g1w, g1b, g1a), 0.0)

    # ---- layer 2: A @ (H @ W2) ----
    hw = jnp.dot(h.astype(bf16), w23_ref[0], preferred_element_type=f32)
    h = jnp.dot(adj, hw.astype(bf16), preferred_element_type=f32) + b2
    h = jnp.maximum(graph_norm(h, g2w, g2b, g2a), 0.0)

    # ---- layer 3: A @ (H @ W3) ----
    hw = jnp.dot(h.astype(bf16), w23_ref[1], preferred_element_type=f32)
    h = jnp.dot(adj, hw.astype(bf16), preferred_element_type=f32) + b3
    h = graph_norm(h, g3w, g3b, g3a)

    # ---- global_mean_pool -> [G, H] ----
    pooled = jnp.dot(pool_ref[...], h.astype(bf16), preferred_element_type=f32)

    # ---- dropout (eval = identity) + fused lin1∘lin2∘lin3 ----
    z = jnp.dot(pooled.astype(bf16), wlin_ref[...], preferred_element_type=f32) + blin_ref[...]
    out_ref[...] = z.astype(out_ref.dtype)


# ------------------------------ JAX wrapper ------------------------------- #
def gcn_forward(adj, pool, x, params):
    num_graphs = pool.shape[0]
    out_channels = params["lw3"].shape[1]
    bf16 = jnp.bfloat16

    # Fuse the three tail Linear layers offline (no nonlinearity between them).
    wlin = params["lw1"] @ params["lw2"] @ params["lw3"]
    blin = (params["lb1"] @ params["lw2"] + params["lb2"]) @ params["lw3"] + params["lb3"]

    # Pack all (1, H) vectors into one (12, H) array -> single DMA.
    vec = jnp.concatenate([
        params["b1"], params["g1w"], params["g1b"], params["g1a"],
        params["b2"], params["g2w"], params["g2b"], params["g2a"],
        params["b3"], params["g3w"], params["g3b"], params["g3a"],
    ], axis=0).astype(jnp.float32)

    w23 = jnp.stack([params["w2"], params["w3"]], axis=0).astype(bf16)

    args = (adj.astype(bf16), pool.astype(bf16), x.astype(bf16),
            params["w1"].astype(bf16), w23, wlin.astype(bf16),
            vec, blin.astype(jnp.float32))

    vmem_spec = pl.BlockSpec(memory_space=pltpu.MemorySpace.VMEM)
    return pl.pallas_call(
        gcn_forward_kernel,
        out_shape=jax.ShapeDtypeStruct((num_graphs, out_channels), jnp.float32),
        in_specs=[vmem_spec] * len(args),
        out_specs=vmem_spec,
        compiler_params=pltpu.CompilerParams(vmem_limit_bytes=64 << 20),
    )(*args)


# ------------------------------ glue helpers ------------------------------ #
def build_normalized_adjacency(edge_index, num_nodes):
    """A_hat = D^-1/2 (A + I) D^-1/2 ; A[i, j] = 1 if edge j -> i.
    Note: duplicate edges accumulate weight > 1 (same as scatter-add in PyG)."""
    src, dst = edge_index[0], edge_index[1]
    a = jnp.zeros((num_nodes, num_nodes), jnp.float32).at[dst, src].add(1.0)
    a = a + jnp.eye(num_nodes, dtype=jnp.float32)        # add self loops
    deg = jnp.sum(a, axis=1)
    dinv = jnp.where(deg > 0, 1.0 / jnp.sqrt(deg), 0.0)
    return dinv[:, None] * a * dinv[None, :]


def build_mean_pool_matrix(batch, num_graphs):
    """P[g, i] = 1/count_g if batch[i] == g else 0."""
    onehot = (batch[None, :] == jnp.arange(num_graphs)[:, None]).astype(jnp.float32)
    counts = jnp.maximum(jnp.sum(onehot, axis=1, keepdims=True), 1.0)
    return onehot / counts


def init_params(key, in_channels, hidden_channels, out_channels):
    ks = jax.random.split(key, 12)

    def glorot(k, fan_in, fan_out):
        lim = jnp.sqrt(6.0 / (fan_in + fan_out))
        return jax.random.uniform(k, (fan_in, fan_out), jnp.float32, -lim, lim)

    ones = lambda n: jnp.ones((1, n), jnp.float32)
    zeros = lambda n: jnp.zeros((1, n), jnp.float32)

    return {
        # GCNConv weights [in, out], bias [1, out]
        "w1": glorot(ks[0], in_channels, hidden_channels), "b1": zeros(hidden_channels),
        "w2": glorot(ks[1], hidden_channels, hidden_channels), "b2": zeros(hidden_channels),
        "w3": glorot(ks[2], hidden_channels, hidden_channels), "b3": zeros(hidden_channels),
        # GraphNorm: weight=1, bias=0, mean_scale(alpha)=1
        "g1w": ones(hidden_channels), "g1b": zeros(hidden_channels), "g1a": ones(hidden_channels),
        "g2w": ones(hidden_channels), "g2b": zeros(hidden_channels), "g2a": ones(hidden_channels),
        "g3w": ones(hidden_channels), "g3b": zeros(hidden_channels), "g3a": ones(hidden_channels),
        # Linear layers stored as [in, out] (transposed vs torch's [out, in]), bias [1, out]
        "lw1": glorot(ks[3], hidden_channels, hidden_channels),
        "lb1": jax.random.uniform(ks[4], (1, hidden_channels), jnp.float32, -0.1, 0.1),
        "lw2": glorot(ks[5], hidden_channels, hidden_channels),
        "lb2": jax.random.uniform(ks[6], (1, hidden_channels), jnp.float32, -0.1, 0.1),
        "lw3": glorot(ks[7], hidden_channels, out_channels),
        "lb3": jax.random.uniform(ks[8], (1, out_channels), jnp.float32, -0.1, 0.1),
    }


# -------------------------- pure-JAX references ---------------------------- #
def _gnorm_f32(h, w, b, a, eps=1e-5):
    mean = jnp.mean(h, axis=0, keepdims=True)
    c = h - a * mean
    var = jnp.mean(c * c, axis=0, keepdims=True)
    return w * c / jnp.sqrt(var + eps) + b


def gcn_forward_ref_f32(adj, pool, x, p):
    """Canonical f32 forward (original op order, unfused linears)."""
    def conv(h, w, b):
        return adj @ (h @ w) + b
    h = jnp.maximum(_gnorm_f32(conv(x, p["w1"], p["b1"]), p["g1w"], p["g1b"], p["g1a"]), 0.0)
    h = jnp.maximum(_gnorm_f32(conv(h, p["w2"], p["b2"]), p["g2w"], p["g2b"], p["g2a"]), 0.0)
    h = _gnorm_f32(conv(h, p["w3"], p["b3"]), p["g3w"], p["g3b"], p["g3a"])
    z = pool @ h
    z = z @ p["lw1"] + p["lb1"]
    z = z @ p["lw2"] + p["lb2"]
    z = z @ p["lw3"] + p["lb3"]
    return z


def gcn_forward_ref_bf16(adj, pool, x, p):
    """Mirrors the kernel math (bf16 matmul operands, f32 accumulation, reordered
    layer 1, fused tail linears) to validate the Pallas plumbing tightly."""
    f32, bf16 = jnp.float32, jnp.bfloat16
    dot = lambda a, b: jnp.dot(a.astype(bf16), b.astype(bf16), preferred_element_type=f32)

    ax = dot(adj, x)
    h = dot(ax, p["w1"]) + p["b1"]
    h = jnp.maximum(_gnorm_f32(h, p["g1w"], p["g1b"], p["g1a"]), 0.0)
    h = dot(adj, dot(h, p["w2"])) + p["b2"]
    h = jnp.maximum(_gnorm_f32(h, p["g2w"], p["g2b"], p["g2a"]), 0.0)
    h = dot(adj, dot(h, p["w3"])) + p["b3"]
    h = _gnorm_f32(h, p["g3w"], p["g3b"], p["g3a"])
    pooled = dot(pool, h)
    wlin = p["lw1"] @ p["lw2"] @ p["lw3"]
    blin = (p["lb1"] @ p["lw2"] + p["lb2"]) @ p["lw3"] + p["lb3"]
    return dot(pooled, wlin) + blin


# --------------------------------- main ------------------------------------ #
if __name__ == "__main__":
    key = jax.random.PRNGKey(0)
    k_x, k_e, k_p = jax.random.split(key, 3)

    # Batched-graph sizes: 8 graphs x 16 nodes = 128 nodes (fills MXU sublanes/lanes).
    num_nodes = 128
    in_channels, hidden_channels, out_channels = 8, 32, 4
    num_graphs = 8
    num_edges = 256

    # Node features
    x = jax.random.normal(k_x, (num_nodes, in_channels), jnp.float32)

    # Random undirected edges (both directions), no self loops
    src = jax.random.randint(k_e, (num_edges,), 0, num_nodes)
    dst = (src + 1 + jax.random.randint(jax.random.fold_in(k_e, 1),
                                        (num_edges,), 0, num_nodes - 1)) % num_nodes
    edge_index = jnp.stack([jnp.concatenate([src, dst]),
                            jnp.concatenate([dst, src])], axis=0)

    # Batch assignment: 8 contiguous graphs of 16 nodes each
    batch = jnp.repeat(jnp.arange(num_graphs, dtype=jnp.int32), num_nodes // num_graphs)

    adj = build_normalized_adjacency(edge_index, num_nodes)
    pool = build_mean_pool_matrix(batch, num_graphs)
    params = init_params(k_p, in_channels, hidden_channels, out_channels)

    out = gcn_forward(adj, pool, x, params)
    out = jax.block_until_ready(out)
    assert out.shape == (num_graphs, out_channels)

    # 1) Algebraic rearrangements (layer-1 reorder + fused linears) preserve f32 math:
    ref_f32 = gcn_forward_ref_f32(adj, pool, x, params)
    # 2) Kernel matches the bf16-matmul / f32-accumulate reference that mirrors it:
    ref_bf16 = gcn_forward_ref_bf16(adj, pool, x, params)
    assert jnp.allclose(out, ref_bf16, atol=1e-3, rtol=1e-3), "mismatch vs bf16-mirror reference"
    # 3) Loose end-to-end sanity vs the canonical f32 reference (bf16 rounding only):
    assert jnp.allclose(out, ref_f32, atol=1e-1, rtol=1e-1), "mismatch vs f32 reference"

    print("KERNEL_OK")
</pallas_src>

<mosaic_0001>
module attributes {stable_mosaic.version = 11 : i64} {
  func.func @gcn_forward_kernel(%arg0: memref<128x128xbf16, #tpu.memory_space<vmem>>, %arg1: memref<8x128xbf16, #tpu.memory_space<vmem>>, %arg2: memref<128x8xbf16, #tpu.memory_space<vmem>>, %arg3: memref<8x32xbf16, #tpu.memory_space<vmem>>, %arg4: memref<2x32x32xbf16, #tpu.memory_space<vmem>>, %arg5: memref<32x4xbf16, #tpu.memory_space<vmem>>, %arg6: memref<12x32xf32, #tpu.memory_space<vmem>>, %arg7: memref<1x4xf32, #tpu.memory_space<vmem>>, %arg8: memref<8x4xf32, #tpu.memory_space<vmem>>) attributes {dimension_semantics = [], scalar_prefetch = 0 : i64, scratch_operands = 0 : i64, tpu.core_type = #tpu.core_type<tc>} {
    %c0 = arith.constant 0 : index
    %c0_0 = arith.constant 0 : index
    %0 = vector.load %arg0[%c0, %c0_0] : memref<128x128xbf16, #tpu.memory_space<vmem>>, vector<128x128xbf16>
    %c0_1 = arith.constant 0 : index
    %c0_2 = arith.constant 0 : index
    %1 = vector.load %arg6[%c0_1, %c0_2] : memref<12x32xf32, #tpu.memory_space<vmem>>, vector<12x32xf32>
    %2 = vector.extract_strided_slice %1 {offsets = [0, 0], sizes = [1, 32], strides = [1, 1]} : vector<12x32xf32> to vector<1x32xf32>
    %3 = vector.extract_strided_slice %1 {offsets = [1, 0], sizes = [1, 32], strides = [1, 1]} : vector<12x32xf32> to vector<1x32xf32>
    %4 = vector.extract_strided_slice %1 {offsets = [2, 0], sizes = [1, 32], strides = [1, 1]} : vector<12x32xf32> to vector<1x32xf32>
    %5 = vector.extract_strided_slice %1 {offsets = [3, 0], sizes = [1, 32], strides = [1, 1]} : vector<12x32xf32> to vector<1x32xf32>
    %6 = vector.extract_strided_slice %1 {offsets = [4, 0], sizes = [1, 32], strides = [1, 1]} : vector<12x32xf32> to vector<1x32xf32>
    %7 = vector.extract_strided_slice %1 {offsets = [5, 0], sizes = [1, 32], strides = [1, 1]} : vector<12x32xf32> to vector<1x32xf32>
    %8 = vector.extract_strided_slice %1 {offsets = [6, 0], sizes = [1, 32], strides = [1, 1]} : vector<12x32xf32> to vector<1x32xf32>
    %9 = vector.extract_strided_slice %1 {offsets = [7, 0], sizes = [1, 32], strides = [1, 1]} : vector<12x32xf32> to vector<1x32xf32>
    %10 = vector.extract_strided_slice %1 {offsets = [8, 0], sizes = [1, 32], strides = [1, 1]} : vector<12x32xf32> to vector<1x32xf32>
    %11 = vector.extract_strided_slice %1 {offsets = [9, 0], sizes = [1, 32], strides = [1, 1]} : vector<12x32xf32> to vector<1x32xf32>
    %12 = vector.extract_strided_slice %1 {offsets = [10, 0], sizes = [1, 32], strides = [1, 1]} : vector<12x32xf32> to vector<1x32xf32>
    %13 = vector.extract_strided_slice %1 {offsets = [11, 0], sizes = [1, 32], strides = [1, 1]} : vector<12x32xf32> to vector<1x32xf32>
    %c0_3 = arith.constant 0 : index
    %c0_4 = arith.constant 0 : index
    %14 = vector.load %arg2[%c0_3, %c0_4] : memref<128x8xbf16, #tpu.memory_space<vmem>>, vector<128x8xbf16>
    %cst = arith.constant dense<0.000000e+00> : vector<128x8xf32>
    %15 = tpu.matmul %0, %14, %cst {dimension_numbers = #tpu.dot_dimension_numbers<[1], [0], [0], [1], [0, 0, 1, 1], [], []>} : vector<128x128xbf16>, vector<128x8xbf16>, vector<128x8xf32> -> vector<128x8xf32>
    %16 = arith.truncf %15 : vector<128x8xf32> to vector<128x8xbf16>
    %c0_5 = arith.constant 0 : index
    %c0_6 = arith.constant 0 : index
    %17 = vector.load %arg3[%c0_5, %c0_6] : memref<8x32xbf16, #tpu.memory_space<vmem>>, vector<8x32xbf16>
    %cst_7 = arith.constant dense<0.000000e+00> : vector<128x32xf32>
    %18 = tpu.matmul %16, %17, %cst_7 {dimension_numbers = #tpu.dot_dimension_numbers<[1], [0], [0], [1], [0, 0, 1, 1], [], []>} : vector<128x8xbf16>, vector<8x32xbf16>, vector<128x32xf32> -> vector<128x32xf32>
    %19 = vector.broadcast %2 : vector<1x32xf32> to vector<128x32xf32>
    %20 = arith.addf %18, %19 : vector<128x32xf32>
    %cst_8 = arith.constant dense<0.000000e+00> : vector<32xf32>
    %21 = vector.multi_reduction <add>, %20, %cst_8 [0] : vector<128x32xf32> to vector<32xf32>
    %22 = vector.shape_cast %21 : vector<32xf32> to vector<1x32xf32>
    %cst_9 = arith.constant 1.280000e+02 : f32
    %23 = vector.broadcast %cst_9 : f32 to vector<1x32xf32>
    %24 = arith.divf %22, %23 : vector<1x32xf32>
    %25 = arith.mulf %5, %24 : vector<1x32xf32>
    %26 = vector.broadcast %25 : vector<1x32xf32> to vector<128x32xf32>
    %27 = arith.subf %20, %26 : vector<128x32xf32>
    %28 = arith.mulf %27, %27 : vector<128x32xf32>
    %cst_10 = arith.constant dense<0.000000e+00> : vector<32xf32>
    %29 = vector.multi_reduction <add>, %28, %cst_10 [0] : vector<128x32xf32> to vector<32xf32>
    %30 = vector.shape_cast %29 : vector<32xf32> to vector<1x32xf32>
    %cst_11 = arith.constant 1.280000e+02 : f32
    %31 = vector.broadcast %cst_11 : f32 to vector<1x32xf32>
    %32 = arith.divf %30, %31 : vector<1x32xf32>
    %33 = vector.broadcast %3 : vector<1x32xf32> to vector<128x32xf32>
    %34 = arith.mulf %33, %27 : vector<128x32xf32>
    %cst_12 = arith.constant 9.99999974E-6 : f32
    %35 = vector.broadcast %cst_12 : f32 to vector<1x32xf32>
    %36 = arith.addf %32, %35 : vector<1x32xf32>
    %37 = math.rsqrt %36 : vector<1x32xf32>
    %38 = vector.broadcast %37 : vector<1x32xf32> to vector<128x32xf32>
    %39 = arith.mulf %34, %38 : vector<128x32xf32>
    %40 = vector.broadcast %4 : vector<1x32xf32> to vector<128x32xf32>
    %41 = arith.addf %39, %40 : vector<128x32xf32>
    %cst_13 = arith.constant 0.000000e+00 : f32
    %42 = vector.broadcast %cst_13 : f32 to vector<128x32xf32>
    %43 = arith.maximumf %41, %42 : vector<128x32xf32>
    %44 = arith.truncf %43 : vector<128x32xf32> to vector<128x32xbf16>
    %c0_14 = arith.constant 0 : index
    %c0_15 = arith.constant 0 : index
    %c0_16 = arith.constant 0 : index
    %45 = vector.load %arg4[%c0_14, %c0_15, %c0_16] : memref<2x32x32xbf16, #tpu.memory_space<vmem>>, vector<1x32x32xbf16>
    %46 = vector.shape_cast %45 : vector<1x32x32xbf16> to vector<32x32xbf16>
    %cst_17 = arith.constant dense<0.000000e+00> : vector<128x32xf32>
    %47 = tpu.matmul %44, %46, %cst_17 {dimension_numbers = #tpu.dot_dimension_numbers<[1], [0], [0], [1], [0, 0, 1, 1], [], []>} : vector<128x32xbf16>, vector<32x32xbf16>, vector<128x32xf32> -> vector<128x32xf32>
    %48 = arith.truncf %47 : vector<128x32xf32> to vector<128x32xbf16>
    %cst_18 = arith.constant dense<0.000000e+00> : vector<128x32xf32>
    %49 = tpu.matmul %0, %48, %cst_18 {dimension_numbers = #tpu.dot_dimension_numbers<[1], [0], [0], [1], [0, 0, 1, 1], [], []>} : vector<128x128xbf16>, vector<128x32xbf16>, vector<128x32xf32> -> vector<128x32xf32>
    %50 = vector.broadcast %6 : vector<1x32xf32> to vector<128x32xf32>
    %51 = arith.addf %49, %50 : vector<128x32xf32>
    %cst_19 = arith.constant dense<0.000000e+00> : vector<32xf32>
    %52 = vector.multi_reduction <add>, %51, %cst_19 [0] : vector<128x32xf32> to vector<32xf32>
    %53 = vector.shape_cast %52 : vector<32xf32> to vector<1x32xf32>
    %cst_20 = arith.constant 1.280000e+02 : f32
    %54 = vector.broadcast %cst_20 : f32 to vector<1x32xf32>
    %55 = arith.divf %53, %54 : vector<1x32xf32>
    %56 = arith.mulf %9, %55 : vector<1x32xf32>
    %57 = vector.broadcast %56 : vector<1x32xf32> to vector<128x32xf32>
    %58 = arith.subf %51, %57 : vector<128x32xf32>
    %59 = arith.mulf %58, %58 : vector<128x32xf32>
    %cst_21 = arith.constant dense<0.000000e+00> : vector<32xf32>
    %60 = vector.multi_reduction <add>, %59, %cst_21 [0] : vector<128x32xf32> to vector<32xf32>
    %61 = vector.shape_cast %60 : vector<32xf32> to vector<1x32xf32>
    %cst_22 = arith.constant 1.280000e+02 : f32
    %62 = vector.broadcast %cst_22 : f32 to vector<1x32xf32>
    %63 = arith.divf %61, %62 : vector<1x32xf32>
    %64 = vector.broadcast %7 : vector<1x32xf32> to vector<128x32xf32>
    %65 = arith.mulf %64, %58 : vector<128x32xf32>
    %cst_23 = arith.constant 9.99999974E-6 : f32
    %66 = vector.broadcast %cst_23 : f32 to vector<1x32xf32>
    %67 = arith.addf %63, %66 : vector<1x32xf32>
    %68 = math.rsqrt %67 : vector<1x32xf32>
    %69 = vector.broadcast %68 : vector<1x32xf32> to vector<128x32xf32>
    %70 = arith.mulf %65, %69 : vector<128x32xf32>
    %71 = vector.broadcast %8 : vector<1x32xf32> to vector<128x32xf32>
    %72 = arith.addf %70, %71 : vector<128x32xf32>
    %cst_24 = arith.constant 0.000000e+00 : f32
    %73 = vector.broadcast %cst_24 : f32 to vector<128x32xf32>
    %74 = arith.maximumf %72, %73 : vector<128x32xf32>
    %75 = arith.truncf %74 : vector<128x32xf32> to vector<128x32xbf16>
    %c1 = arith.constant 1 : index
    %c0_25 = arith.constant 0 : index
    %c0_26 = arith.constant 0 : index
    %76 = vector.load %arg4[%c1, %c0_25, %c0_26] : memref<2x32x32xbf16, #tpu.memory_space<vmem>>, vector<1x32x32xbf16>
    %77 = vector.shape_cast %76 : vector<1x32x32xbf16> to vector<32x32xbf16>
    %cst_27 = arith.constant dense<0.000000e+00> : vector<128x32xf32>
    %78 = tpu.matmul %75, %77, %cst_27 {dimension_numbers = #tpu.dot_dimension_numbers<[1], [0], [0], [1], [0, 0, 1, 1], [], []>} : vector<128x32xbf16>, vector<32x32xbf16>, vector<128x32xf32> -> vector<128x32xf32>
    %79 = arith.truncf %78 : vector<128x32xf32> to vector<128x32xbf16>
    %cst_28 = arith.constant dense<0.000000e+00> : vector<128x32xf32>
    %80 = tpu.matmul %0, %79, %cst_28 {dimension_numbers = #tpu.dot_dimension_numbers<[1], [0], [0], [1], [0, 0, 1, 1], [], []>} : vector<128x128xbf16>, vector<128x32xbf16>, vector<128x32xf32> -> vector<128x32xf32>
    %81 = vector.broadcast %10 : vector<1x32xf32> to vector<128x32xf32>
    %82 = arith.addf %80, %81 : vector<128x32xf32>
    %cst_29 = arith.constant dense<0.000000e+00> : vector<32xf32>
    %83 = vector.multi_reduction <add>, %82, %cst_29 [0] : vector<128x32xf32> to vector<32xf32>
    %84 = vector.shape_cast %83 : vector<32xf32> to vector<1x32xf32>
    %cst_30 = arith.constant 1.280000e+02 : f32
    %85 = vector.broadcast %cst_30 : f32 to vector<1x32xf32>
    %86 = arith.divf %84, %85 : vector<1x32xf32>
    %87 = arith.mulf %13, %86 : vector<1x32xf32>
    %88 = vector.broadcast %87 : vector<1x32xf32> to vector<128x32xf32>
    %89 = arith.subf %82, %88 : vector<128x32xf32>
    %90 = arith.mulf %89, %89 : vector<128x32xf32>
    %cst_31 = arith.constant dense<0.000000e+00> : vector<32xf32>
    %91 = vector.multi_reduction <add>, %90, %cst_31 [0] : vector<128x32xf32> to vector<32xf32>
    %92 = vector.shape_cast %91 : vector<32xf32> to vector<1x32xf32>
    %cst_32 = arith.constant 1.280000e+02 : f32
    %93 = vector.broadcast %cst_32 : f32 to vector<1x32xf32>
    %94 = arith.divf %92, %93 : vector<1x32xf32>
    %95 = vector.broadcast %11 : vector<1x32xf32> to vector<128x32xf32>
    %96 = arith.mulf %95, %89 : vector<128x32xf32>
    %cst_33 = arith.constant 9.99999974E-6 : f32
    %97 = vector.broadcast %cst_33 : f32 to vector<1x32xf32>
    %98 = arith.addf %94, %97 : vector<1x32xf32>
    %99 = math.rsqrt %98 : vector<1x32xf32>
    %100 = vector.broadcast %99 : vector<1x32xf32> to vector<128x32xf32>
    %101 = arith.mulf %96, %100 : vector<128x32xf32>
    %102 = vector.broadcast %12 : vector<1x32xf32> to vector<128x32xf32>
    %103 = arith.addf %101, %102 : vector<128x32xf32>
    %c0_34 = arith.constant 0 : index
    %c0_35 = arith.constant 0 : index
    %104 = vector.load %arg1[%c0_34, %c0_35] : memref<8x128xbf16, #tpu.memory_space<vmem>>, vector<8x128xbf16>
    %105 = arith.truncf %103 : vector<128x32xf32> to vector<128x32xbf16>
    %cst_36 = arith.constant dense<0.000000e+00> : vector<8x32xf32>
    %106 = tpu.matmul %104, %105, %cst_36 {dimension_numbers = #tpu.dot_dimension_numbers<[1], [0], [0], [1], [0, 0, 1, 1], [], []>} : vector<8x128xbf16>, vector<128x32xbf16>, vector<8x32xf32> -> vector<8x32xf32>
    %107 = arith.truncf %106 : vector<8x32xf32> to vector<8x32xbf16>
    %c0_37 = arith.constant 0 : index
    %c0_38 = arith.constant 0 : index
    %108 = vector.load %arg5[%c0_37, %c0_38] : memref<32x4xbf16, #tpu.memory_space<vmem>>, vector<32x4xbf16>
    %cst_39 = arith.constant dense<0.000000e+00> : vector<8x4xf32>
    %109 = tpu.matmul %107, %108, %cst_39 {dimension_numbers = #tpu.dot_dimension_numbers<[1], [0], [0], [1], [0, 0, 1, 1], [], []>} : vector<8x32xbf16>, vector<32x4xbf16>, vector<8x4xf32> -> vector<8x4xf32>
    %c0_40 = arith.constant 0 : index
    %c0_41 = arith.constant 0 : index
    %110 = vector.load %arg7[%c0_40, %c0_41] : memref<1x4xf32, #tpu.memory_space<vmem>>, vector<1x4xf32>
    %111 = vector.broadcast %110 : vector<1x4xf32> to vector<8x4xf32>
    %112 = arith.addf %109, %111 : vector<8x4xf32>
    %c0_42 = arith.constant 0 : index
    %c0_43 = arith.constant 0 : index
    %113 = vector.load %arg8[%c0_42, %c0_43] : memref<8x4xf32, #tpu.memory_space<vmem>>, vector<8x4xf32>
    tpu.vector_store %arg8[%c0_42, %c0_43], %112 {strides = array<i32>} : memref<8x4xf32, #tpu.memory_space<vmem>>, vector<8x4xf32>,
    return
  }
}

</mosaic_0001>

<bundles_post_ra>
// kernel: tpu_custom_call.1
= control target key start
LH: loop header
LB: loop body
LE: loop exit
PB: predicated region body
PF: predicated region fallthrough
CT: control target
= control target key end

     0   :  { %13 = vsyncpa [#allocation3], 0  ;;  %s2996_s0 = inlined_call_operand.hbm [shape: bf16[128,128], index: 0, kind: input, shape index: {}]   ;;  %s2997_s1 = inlined_call_operand.hbm [shape: bf16[8,128], index: 1, kind: input, shape index: {}]   ;;  %s2998_s2 = inlined_call_operand.hbm [shape: bf16[128,8], index: 2, kind: input, shape index: {}]   ;;  %s2999_s3 = inlined_call_operand.hbm [shape: bf16[8,32], index: 3, kind: input, shape index: {}]   ;;  %s3000_s4 = inlined_call_operand.hbm [shape: bf16[2,32,32], index: 4, kind: input, shape index: {}]   ;;  %s3001_s5 = inlined_call_operand.hbm [shape: bf16[32,4], index: 5, kind: input, shape index: {}]   ;;  %s3002_s6 = inlined_call_operand.hbm [shape: f32[12,32], index: 6, kind: input, shape index: {}]   ;;  %s3003_s7 = inlined_call_operand.hbm [shape: f32[1,4], index: 7, kind: input, shape index: {}]   ;;  %s3004_s8 = inlined_call_operand.hbm [shape: f32[8,4], index: 8, kind: output, shape index: {}]  }
   0x1   :  { %14 = vsyncpa [#allocation6], 0 }
   0x2   :  { %15 = vsyncpa [#allocation9], 0 }
   0x3   :  { %16 = vsyncpa [#allocation12], 0 }
   0x4   :  { %17 = vsyncpa [#allocation15], 0 }
   0x5   :  { %18 = vsyncpa [#allocation4], 0  ;;  %s2273_s27 = smov [#allocation5]   ;;  %s2274_s29 = smov [#allocation8]  }
   0x6   :  { %s37_s28 = sshll.u32 %s2273_s27, 4  ;;  %s59_s30 = sshll.u32 %s2274_s29, 4  ;;  %s38_s28 = int_to_ptr.vmem [resolvable:$true] %s37_s28  ;;  %s60_s30 = int_to_ptr.vmem [resolvable:$true] %s59_s30 }
   0x7   :  { %s2063_s11 = scalar_lea.hbm %s2997_s1, 64 }
   0x8   :  { %p2064_p0 = scmp.ne.s32.totalorder %s2997_s1, %s2063_s11  ;;  %p2067_p1 = scmp.lt.u32.totalorder %s2063_s11, %s2997_s1 }
   0xa   :  { %p2069_p2 = pnand %p2067_p1, %p2064_p0 }
   0xc   :  { %2072 = shalt.err (!%p2069_p2)
}
   0xd   :  { %s2073_s16 = scalar_lea.vmem %s38_s28, 64  ;;  %p2078_p4 = scmp.lt.s32.totalorder %s38_s28, %s38_s28 }
   0xe   :  { %p2074_p3 = scmp.ne.s32.totalorder %s38_s28, %s2073_s16  ;;  %p2079_p5 = scmp.lt.s32.totalorder %s2073_s16, %s2073_s16 }
  0x10   :  { %p2080_p6 = por %p2079_p5, %p2078_p4 }
  0x12   :  { %p2081_p7 = pnand %p2080_p6, %p2074_p3 }
  0x14   :  { %2084 = shalt.err (!%p2081_p7)
}
  0x15   :  { %40 = dma.hbm_to_vmem [thread:$0]  %s2997_s1, 64, %s38_s28, [#allocation6]  }
  0x16   :  { %s2085_s21 = scalar_lea.hbm %s2999_s3, 64 }
  0x17   :  { %p2086_p8 = scmp.ne.s32.totalorder %s2999_s3, %s2085_s21  ;;  %p2089_p9 = scmp.lt.u32.totalorder %s2085_s21, %s2999_s3 }
  0x19   :  { %p2091_p10 = pnand %p2089_p9, %p2086_p8 }
  0x1b   :  { %2094 = shalt.err (!%p2091_p10)
}
  0x1c   :  { %s2095_s26 = scalar_lea.vmem %s60_s30, 64  ;;  %p2100_p12 = scmp.lt.s32.totalorder %s60_s30, %s60_s30 }
  0x1d   :  { %p2096_p11 = scmp.ne.s32.totalorder %s60_s30, %s2095_s26  ;;  %p2101_p13 = scmp.lt.s32.totalorder %s2095_s26, %s2095_s26 }
  0x1f   :  { %p2102_p0 = por %p2101_p13, %p2100_p12 }
  0x21   :  { %p2103_p1 = pnand %p2102_p0, %p2096_p11 }
  0x23   :  { %2106 = shalt.err (!%p2103_p1)
}
  0x24   :  { %62 = dma.hbm_to_vmem [thread:$0]  %s2999_s3, 64, %s60_s30, [#allocation9]  }
  0x25   :  { %s2275_s28 = smov [#allocation11]   ;;  %s2276_s9 = smov [#allocation2]  }
  0x26   :  { %s80_s29 = sshll.u32 %s2275_s28, 4  ;;  %s24_s10 = sshll.u32 %s2276_s9, 4  ;;  %s81_s29 = int_to_ptr.vmem [resolvable:$true] %s80_s29  ;;  %s2357_s10 = int_to_ptr.vmem [resolvable:$true] %s24_s10 }
  0x27   :  { %s2107_s13 = scalar_lea.hbm %s3001_s5, 256 }
  0x28   :  { %p2108_p2 = scmp.ne.s32.totalorder %s3001_s5, %s2107_s13  ;;  %p2111_p3 = scmp.lt.u32.totalorder %s2107_s13, %s3001_s5 }
  0x2a   :  { %p2113_p4 = pnand %p2111_p3, %p2108_p2 }
  0x2c   :  { %2116 = shalt.err (!%p2113_p4)
}
  0x2d   :  { %s2117_s3 = scalar_lea.vmem %s81_s29, 256  ;;  %p2122_p6 = scmp.lt.s32.totalorder %s81_s29, %s81_s29 }
  0x2e   :  { %p2118_p5 = scmp.ne.s32.totalorder %s81_s29, %s2117_s3  ;;  %p2123_p7 = scmp.lt.s32.totalorder %s2117_s3, %s2117_s3 }
  0x30   :  { %p2124_p8 = por %p2123_p7, %p2122_p6 }
  0x32   :  { %p2125_p9 = pnand %p2124_p8, %p2118_p5 }
  0x34   :  { %2128 = shalt.err (!%p2125_p9)
}
  0x35   :  { %s2277_s30 = smov 64   ;;  %s2278_s18 = smov 4  }
  0x36   :  { %86 = dma.hbm_to_vmem [thread:$0]  %s3001_s5, 256, %s81_s29, [#allocation12], %s2277_s30, %s2277_s30, %s2278_s18  }
  0x37   :  { %s2129_s23 = scalar_lea.hbm %s2996_s0, 1024 }
  0x38   :  { %p2130_p10 = scmp.ne.s32.totalorder %s2996_s0, %s2129_s23  ;;  %p2133_p11 = scmp.lt.u32.totalorder %s2129_s23, %s2996_s0 }
  0x3a   :  { %p2135_p12 = pnand %p2133_p11, %p2130_p10 }
  0x3c   :  { %2138 = shalt.err (!%p2135_p12)
}
  0x3d   :  { %s2139_s27 = scalar_lea.vmem %s2357_s10, 1024  ;;  %p2144_p0 = scmp.lt.s32.totalorder %s2357_s10, %s2357_s10 }
  0x3e   :  { %p2140_p13 = scmp.ne.s32.totalorder %s2357_s10, %s2139_s27  ;;  %p2145_p1 = scmp.lt.s32.totalorder %s2139_s27, %s2139_s27 }
  0x40   :  { %p2146_p2 = por %p2145_p1, %p2144_p0 }
  0x42   :  { %p2147_p3 = pnand %p2146_p2, %p2140_p13 }
  0x44   :  { %2150 = shalt.err (!%p2147_p3)
}
  0x45   :  { %30 = dma.hbm_to_vmem [thread:$0]  %s2996_s0, 1024, %s2357_s10, [#allocation3], %s2277_s30, %s2277_s30, %s2278_s18  }
  0x46   :  { %s2279_s29 = smov [#allocation7]   ;;  %s2280_s11 = smov [#allocation10]  }
  0x47   :  { %s46_s9 = sshll.u32 %s2279_s29, 4  ;;  %s68_s12 = sshll.u32 %s2280_s11, 4  ;;  %s47_s9 = int_to_ptr.vmem [resolvable:$true] %s46_s9  ;;  %s2394_s12 = int_to_ptr.vmem [resolvable:$true] %s68_s12 }
  0x48   :  { %s2151_s15 = scalar_lea.hbm %s2998_s2, 1024 }
  0x49   :  { %p2152_p4 = scmp.ne.s32.totalorder %s2998_s2, %s2151_s15  ;;  %p2155_p5 = scmp.lt.u32.totalorder %s2151_s15, %s2998_s2 }
  0x4b   :  { %p2157_p6 = pnand %p2155_p5, %p2152_p4 }
  0x4d   :  { %2160 = shalt.err (!%p2157_p6)
}
  0x4e   :  { %s2161_s0 = scalar_lea.vmem %s47_s9, 1024  ;;  %p2166_p8 = scmp.lt.s32.totalorder %s47_s9, %s47_s9 }
  0x4f   :  { %p2162_p7 = scmp.ne.s32.totalorder %s47_s9, %s2161_s0  ;;  %p2167_p9 = scmp.lt.s32.totalorder %s2161_s0, %s2161_s0 }
  0x51   :  { %p2168_p10 = por %p2167_p9, %p2166_p8 }
  0x53   :  { %p2169_p11 = pnand %p2168_p10, %p2162_p7 }
  0x55   :  { %2172 = shalt.err (!%p2169_p11)
}
  0x56   :  { %52 = dma.hbm_to_vmem [thread:$0]  %s2998_s2, 1024, %s47_s9, [#allocation6], %s2277_s30, %s2277_s30, %s2278_s18  }
  0x57   :  { %s2173_s23 = scalar_lea.hbm %s3000_s4, 512 }
  0x58   :  { %p2174_p12 = scmp.ne.s32.totalorder %s3000_s4, %s2173_s23  ;;  %p2177_p13 = scmp.lt.u32.totalorder %s2173_s23, %s3000_s4 }
  0x5a   :  { %p2179_p0 = pnand %p2177_p13, %p2174_p12 }
  0x5c   :  { %2182 = shalt.err (!%p2179_p0)
}
  0x5d   :  { %s2183_s27 = scalar_lea.vmem %s2394_s12, 512  ;;  %p2188_p2 = scmp.lt.s32.totalorder %s2394_s12, %s2394_s12 }
  0x5e   :  { %p2184_p1 = scmp.ne.s32.totalorder %s2394_s12, %s2183_s27  ;;  %p2189_p3 = scmp.lt.s32.totalorder %s2183_s27, %s2183_s27 }
  0x60   :  { %p2190_p4 = por %p2189_p3, %p2188_p2 }
  0x62   :  { %p2191_p5 = pnand %p2190_p4, %p2184_p1 }
  0x64   :  { %2194 = shalt.err (!%p2191_p5)
}
  0x65   :  { %74 = dma.hbm_to_vmem [thread:$0]  %s3000_s4, 512, %s2394_s12, [#allocation9], %s2277_s30, %s2277_s30, %s2278_s18  }
  0x66   :  { %s2281_s28 = smov [#allocation13]   ;;  %s2195_s13 = scalar_lea.hbm %s3002_s6, 256 }
  0x67   :  { %s92_s29 = sshll.u32 %s2281_s28, 4  ;;  %p2196_p6 = scmp.ne.s32.totalorder %s3002_s6, %s2195_s13  ;;  %s93_s29 = int_to_ptr.vmem [resolvable:$true] %s92_s29 }
  0x68   :  { %p2199_p7 = scmp.lt.u32.totalorder %s2195_s13, %s3002_s6 }
  0x6a   :  { %p2201_p8 = pnand %p2199_p7, %p2196_p6 }
  0x6c   :  { %2204 = shalt.err (!%p2201_p8)
}
  0x6d   :  { %s2205_s3 = scalar_lea.vmem %s93_s29, 256  ;;  %p2210_p10 = scmp.lt.s32.totalorder %s93_s29, %s93_s29 }
  0x6e   :  { %p2206_p9 = scmp.ne.s32.totalorder %s93_s29, %s2205_s3  ;;  %p2211_p11 = scmp.lt.s32.totalorder %s2205_s3, %s2205_s3 }
  0x70   :  { %p2212_p12 = por %p2211_p11, %p2210_p10 }
  0x72   :  { %p2213_p13 = pnand %p2212_p12, %p2206_p9 }
  0x74   :  { %2216 = shalt.err (!%p2213_p13)
}
  0x75   :  { %s2282_s4 = smov 128   ;;  %s2283_s30 = smov 8  }
  0x76   :  { %98 = dma.hbm_to_vmem [thread:$0]  %s3002_s6, 256, %s93_s29, [#allocation12], %s2282_s4, %s2282_s4, %s2283_s30  }
  0x77   :  { %s2284_s19 = smov [#allocation14]   ;;  %s2217_s21 = scalar_lea.hbm %s3003_s7, 16 }
  0x78   :  { %s105_s0 = sshll.u32 %s2284_s19, 4  ;;  %p2218_p0 = scmp.ne.s32.totalorder %s3003_s7, %s2217_s21  ;;  %s106_s0 = int_to_ptr.vmem [resolvable:$true] %s105_s0 }
  0x79   :  { %p2221_p1 = scmp.lt.u32.totalorder %s2217_s21, %s3003_s7 }
  0x7b   :  { %p2223_p2 = pnand %p2221_p1, %p2218_p0 }
  0x7d   :  { %2226 = shalt.err (!%p2223_p2)
}
  0x7e   :  { %s2227_s26 = scalar_lea.vmem %s106_s0, 16  ;;  %s2231_s6 = scalar_lea.vmem %s106_s0, 32 }
  0x7f   :  { %p2228_p3 = scmp.ne.s32.totalorder %s106_s0, %s2227_s26  ;;  %p2232_p4 = scmp.lt.s32.totalorder %s106_s0, %s106_s0 }
  0x80   :  { %p2233_p5 = scmp.lt.s32.totalorder %s2231_s6, %s2227_s26 }
  0x82   :  { %p2234_p6 = por %p2233_p5, %p2232_p4 }
  0x84   :  { %p2235_p7 = pnand %p2234_p6, %p2228_p3 }
  0x86   :  { %2238 = shalt.err (!%p2235_p7)
}
  0x87   :  { %108 = dma.hbm_to_vmem [thread:$0]  %s3003_s7, 16, %s106_s0, [#allocation15]  }
  0x88   :  { %2261 = dma.done.wait [#allocation3], 1024  }
  0x89   :  { %2262 = vsyncadd [#allocation3], 4294966272 }
  0x8a   :  { %2263 = dma.done.wait [#allocation6], 1088  }
  0x8b   :  { %2264 = vsyncadd [#allocation6], 4294966208 }
  0x8c   :  { %2265 = dma.done.wait [#allocation9], 576  }
  0x8d   :  { %2266 = vsyncadd [#allocation9], 4294966720 }
  0x8e   :  { %2267 = dma.done.wait [#allocation12], 512  }
  0x8f   :  { %2268 = vsyncadd [#allocation12], 4294966784 }
  0x90   :  { %2269 = dma.done.wait [#allocation15], 16  }
  0x91   :  { %2270 = vsyncadd [#allocation15], 4294967280  ;;  %v2028_v0 = vld [vmem:[#allocation7] sm:$0xff]   ;;  %v2029_v1 = vld [vmem:[#allocation7 + $0x8] sm:$0xff]   ;;  %vm399_vm0 = vcmask 1043456   ;;  %vm374_vm1 = vcmask 64512   ;;  %v370_v42 = vlaneseq }
  0x92   :  { %1830 = vmatprep.subr.bf16.mxu0 %v2028_v0  ;;  %v2030_v2 = vld [vmem:[#allocation7 + $0x10] sm:$0xff]   ;;  %v2031_v3 = vld [vmem:[#allocation7 + $0x18] sm:$0xff]   ;;  %v2032_v5 = vld [vmem:[#allocation7 + $0x20] sm:$0xff]   ;;  %vm500_vm2 = vcmask 261120   ;;  %vm2286_vm3 = vmmov 0   ;;  %s2287_s7 = smov [#allocation16]  }
  0x93   :  { %1831 = vmatpush3.bf16.msra.mxu0 %v2028_v0  ;;  %v2455_v4 = vld [vmem:[#allocation2] sm:$0xff]   ;;  %v2033_v6 = vld [vmem:[#allocation7 + $0x28] sm:$0xff]   ;;  %v2034_v7 = vld [vmem:[#allocation7 + $0x30] sm:$0xff]   ;;  %v2488_v43 = vshrl.u32 %v370_v42, 7  ;;  %s1680_s2 = sshll.u32 %s2287_s7, 4  ;;  %vm1672_vm4 = vcmask 31744   ;;  %s1681_s2 = int_to_ptr.vmem [resolvable:$true] %s1680_s2 }
  0x94   :  { %1832 = vmatprep.subr.bf16.mxu0 %v2029_v1  ;;  %1846 = vmatprep.mubr.bf16.mxu0 %v2455_v4  ;;  %v2035_v8 = vld [vmem:[#allocation7 + $0x38] sm:$0xff]   ;;  %v2458_v9 = vld [vmem:[#allocation2 + $0x8] sm:$0xff]   ;;  %v2460_v10 = vld [vmem:[#allocation2 + $0x10] sm:$0xff]   ;;  %s2239_s5 = scalar_lea.vmem %s1681_s2, 128  ;;  %p2244_p9 = scmp.lt.s32.totalorder %s1681_s2, %s1681_s2 }
  0x95   :  { %v2464_v11 = vld [vmem:[#allocation2 + $0x18] sm:$0xff]   ;;  %v2466_v12 = vld [vmem:[#allocation2 + $0x20] sm:$0xff]   ;;  %v2470_v13 = vld [vmem:[#allocation2 + $0x28] sm:$0xff]   ;;  %v372_v44 = vsub.s32 0, %v2488_v43  ;;  %p2240_p8 = scmp.ne.s32.totalorder %s1681_s2, %s2239_s5  ;;  %p2245_p10 = scmp.lt.s32.totalorder %s2239_s5, %s2239_s5 }
  0x96   :  { %v2472_v14 = vld [vmem:[#allocation2 + $0x30] sm:$0xff]   ;;  %v2476_v15 = vld [vmem:[#allocation2 + $0x38] sm:$0xff]   ;;  %v369_v16 = vld [vmem:[#allocation8] sm:$0xf] }
  0x97   :  { %1833 = vmatpush3.bf16.msra.mxu0 %v2029_v1  ;;  %2012 = vmatprep.subr.msk.bf16.mxu1 %vm399_vm0, %v369_v16  ;;  %v401_v17 = vsel %vm399_vm0, %v369_v16, 0  ;;  %v2491_v45 = vld [vmem:[#allocation13] sm:$0xff]  ;;  %v2044_v46 = vld [vmem:[#allocation10] sm:$0xff]   ;;  %v2045_v47 = vld [vmem:[#allocation10 + $0x8] sm:$0xff]   ;;  %p2246_p11 = por %p2245_p10, %p2244_p9 }
  0x98   :  { %1834 = vmatprep.subr.bf16.mxu0 %v2030_v2  ;;  %1863 = vmatpush3.bf16.msra.mxu1 %v401_v17  ;;  %v373_v48 = vrot.slane %v2491_v45, %v372_v44 }
  0x99   :  { %1880 = vmatprep.subr.bf16.mxu1 %v2044_v46  ;;  %p2247_p12 = pnand %p2246_p11, %p2240_p8 }
  0x9b   :  { %1835 = vmatpush3.bf16.msra.mxu0 %v2030_v2 }
  0x9c   :  { %1836 = vmatprep.subr.bf16.mxu0 %v2031_v3 }
  0x9f   :  { %1837 = vmatpush3.bf16.msra.mxu0 %v2031_v3 }
  0xa0   :  { %1838 = vmatprep.subr.bf16.mxu0 %v2032_v5 }
  0xa3   :  { %1839 = vmatpush3.bf16.msra.mxu0 %v2032_v5 }
  0xa4   :  { %1840 = vmatprep.subr.bf16.mxu0 %v2033_v6 }
  0xa7   :  { %1841 = vmatpush3.bf16.msra.mxu0 %v2033_v6 }
  0xa8   :  { %1842 = vmatprep.subr.bf16.mxu0 %v2034_v7 }
  0xab   :  { %1843 = vmatpush3.bf16.msra.mxu0 %v2034_v7 }
  0xac   :  { %1844 = vmatprep.subr.bf16.mxu0 %v2035_v8 }
  0xaf   :  { %1845 = vmatpush3.bf16.msra.mxu0 %v2035_v8 }
  0xb2   :  { %1847 = vmatmul.mubr.bf16.vlgmr.msra.gmra.mrb[0].mxu0 %v2458_v9 }
  0xb3   :  { %1850 = vmatprep.mubr.bf16.mxu0 %v2460_v10 }
  0xba   :  { %1851 = vmatmul.mubr.bf16.gmra.mrb[4].mxu0 %v2464_v11 }
  0xbb   :  { %1854 = vmatprep.mubr.bf16.mxu0 %v2466_v12 }
  0xc2   :  { %1855 = vmatmul.mubr.bf16.gmra.mrb[8].mxu0 %v2470_v13 }
  0xc3   :  { %1858 = vmatprep.mubr.bf16.mxu0 %v2472_v14 }
  0xca   :  { %1859 = vmatmul.mubr.bf16.gmra.mrb[12].mxu0 %v2476_v15 }
  0xcb   :  { %1916 = vmatprep.mubr.bf16.mxu0 %v2455_v4 }
 0x185   :  { %v1848_v18 = vpop.f32.mrb[0].mxu0 }
 0x186   :  { %v298_v19 = vpop.f32.mrb[1].mxu0 }
 0x187   :  { %v1849_v20 = vpop.f32.mrb[2].mxu0 }
 0x188   :  { %v362_v21 = vpack.c.bf16 %v1849_v20, %v1848_v18  ;;  %v301_v22 = vpop.f32.mrb[3].mxu0 }
 0x189   :  { %v361_v23 = vpack.c.bf16 %v301_v22, %v298_v19 }
 0x18b   :  { %1864 = vmatprep.mubr.msk.bf16.mxu1 %vm374_vm1, %v361_v23 }
 0x18c   :  { %1865 = vmatmul.mubr.msk.bf16.vlgmr.msra.gmra.mrb[0].mxu1 %vm374_vm1, %v362_v21 }
 0x18d   :  { %v1852_v24 = vpop.f32.mrb[4].mxu0  ;;  %1881 = vmatpush3.bf16.msra.mxu1 %v2044_v46 }
 0x18e   :  { %v314_v25 = vpop.f32.mrb[5].mxu0  ;;  %1882 = vmatprep.subr.bf16.mxu1 %v2045_v47 }
 0x18f   :  { %v1853_v26 = vpop.f32.mrb[6].mxu0 }
 0x190   :  { %v364_v27 = vpack.c.bf16 %v1853_v26, %v1852_v24  ;;  %v317_v28 = vpop.f32.mrb[7].mxu0 }
 0x191   :  { %v363_v29 = vpack.c.bf16 %v317_v28, %v314_v25  ;;  %1883 = vmatpush3.bf16.msra.mxu1 %v2045_v47 }
 0x193   :  { %1868 = vmatprep.mubr.msk.bf16.mxu1 %vm374_vm1, %v363_v29 }
 0x194   :  { %1869 = vmatmul.mubr.msk.bf16.gmra.mrb[4].mxu1 %vm374_vm1, %v364_v27 }
 0x195   :  { %v1856_v30 = vpop.f32.mrb[8].mxu0 }
 0x196   :  { %v330_v31 = vpop.f32.mrb[9].mxu0 }
 0x197   :  { %v1857_v32 = vpop.f32.mrb[10].mxu0 }
 0x198   :  { %v366_v33 = vpack.c.bf16 %v1857_v32, %v1856_v30  ;;  %v333_v34 = vpop.f32.mrb[11].mxu0 }
 0x199   :  { %v365_v35 = vpack.c.bf16 %v333_v34, %v330_v31 }
 0x19b   :  { %1872 = vmatprep.mubr.msk.bf16.mxu1 %vm374_vm1, %v365_v35 }
 0x19c   :  { %1873 = vmatmul.mubr.msk.bf16.gmra.mrb[8].mxu1 %vm374_vm1, %v366_v33 }
 0x19d   :  { %v1860_v36 = vpop.f32.mrb[12].mxu0 }
 0x19e   :  { %v346_v37 = vpop.f32.mrb[13].mxu0 }
 0x19f   :  { %v1861_v38 = vpop.f32.mrb[14].mxu0 }
 0x1a0   :  { %v368_v39 = vpack.c.bf16 %v1861_v38, %v1860_v36  ;;  %v349_v40 = vpop.f32.mrb[15].mxu0 }
 0x1a1   :  { %v367_v41 = vpack.c.bf16 %v349_v40, %v346_v37 }
 0x1a3   :  { %1876 = vmatprep.mubr.msk.bf16.mxu1 %vm374_vm1, %v367_v41 }
 0x1a4   :  { %1877 = vmatmul.mubr.msk.bf16.gmra.mrb[12].mxu1 %vm374_vm1, %v368_v39 }
 0x25f   :  { %v1866_v49 = vpop.f32.mrb[0].mxu1 }
 0x260   :  { %v437_v50 = vpop.f32.mrb[1].mxu1  ;;  %v2498_v54 = vadd.f32 %v1866_v49, %v373_v48 }
 0x261   :  { %v2496_v51 = vadd.f32 %v437_v50, %v373_v48  ;;  %v1867_v52 = vpop.f32.mrb[2].mxu1 }
 0x262   :  { %v440_v53 = vpop.f32.mrb[3].mxu1  ;;  %v2504_v57 = vadd.f32 %v1867_v52, %v373_v48  ;;  %v504_v60 = vsel %vm500_vm2, %v2498_v54, 0.0 }
 0x263   :  { %v2500_v55 = vadd.f32 %v440_v53, %v373_v48  ;;  %v501_v56 = vsel %vm500_vm2, %v2496_v51, 0.0 }
 0x264   :  { %v506_v0 = vsel %vm500_vm2, %v2504_v57, 0.0 }
 0x265   :  { %v502_v58 = vsel %vm500_vm2, %v2500_v55, 0.0 }
 0x266   :  { %v503_v59 = vadd.f32 %v502_v58, %v501_v56 }
 0x267   :  { %v1870_v61 = vpop.f32.mrb[4].mxu1 }
 0x268   :  { %v505_v62 = vadd.f32 %v504_v60, %v503_v59  ;;  %v453_v63 = vpop.f32.mrb[5].mxu1  ;;  %v462_v6 = vadd.f32 %v1870_v61, %v373_v48 }
 0x269   :  { %v454_v1 = vadd.f32 %v453_v63, %v373_v48  ;;  %v1871_v2 = vpop.f32.mrb[6].mxu1 }
 0x26a   :  { %v507_v3 = vadd.f32 %v506_v0, %v505_v62  ;;  %v456_v5 = vpop.f32.mrb[7].mxu1  ;;  %v465_v17 = vadd.f32 %v1871_v2, %v373_v48  ;;  %v512_v20 = vsel %vm500_vm2, %v462_v6, 0.0 }
 0x26b   :  { %v508_v7 = vsel %vm500_vm2, %v454_v1, 0.0  ;;  %v457_v8 = vadd.f32 %v456_v5, %v373_v48 }
 0x26c   :  { %v509_v16 = vadd.f32 %v508_v7, %v507_v3  ;;  %v514_v24 = vsel %vm500_vm2, %v465_v17, 0.0 }
 0x26d   :  { %v510_v18 = vsel %vm500_vm2, %v457_v8, 0.0 }
 0x26e   :  { %v511_v19 = vadd.f32 %v510_v18, %v509_v16 }
 0x26f   :  { %v1874_v21 = vpop.f32.mrb[8].mxu1 }
 0x270   :  { %v513_v22 = vadd.f32 %v512_v20, %v511_v19  ;;  %v469_v23 = vpop.f32.mrb[9].mxu1  ;;  %v478_v29 = vadd.f32 %v1874_v21, %v373_v48  ;;  %v543_v19 = vsub.s32 3, %v2488_v43 }
 0x271   :  { %v470_v25 = vadd.f32 %v469_v23, %v373_v48  ;;  %v1875_v26 = vpop.f32.mrb[10].mxu1 }
 0x272   :  { %v515_v27 = vadd.f32 %v514_v24, %v513_v22  ;;  %v472_v28 = vpop.f32.mrb[11].mxu1  ;;  %v481_v33 = vadd.f32 %v1875_v26, %v373_v48  ;;  %v520_v36 = vsel %vm500_vm2, %v478_v29, 0.0 }
 0x273   :  { %v516_v30 = vsel %vm500_vm2, %v470_v25, 0.0  ;;  %v473_v31 = vadd.f32 %v472_v28, %v373_v48 }
 0x274   :  { %v517_v32 = vadd.f32 %v516_v30, %v515_v27  ;;  %v522_v40 = vsel %vm500_vm2, %v481_v33, 0.0 }
 0x275   :  { %v518_v34 = vsel %vm500_vm2, %v473_v31, 0.0 }
 0x276   :  { %v519_v35 = vadd.f32 %v518_v34, %v517_v32 }
 0x277   :  { %v1878_v37 = vpop.f32.mrb[12].mxu1 }
 0x278   :  { %v521_v38 = vadd.f32 %v520_v36, %v519_v35  ;;  %v485_v39 = vpop.f32.mrb[13].mxu1  ;;  %v494_v49 = vadd.f32 %v1878_v37, %v373_v48 }
 0x279   :  { %v486_v41 = vadd.f32 %v485_v39, %v373_v48  ;;  %v1879_v42 = vpop.f32.mrb[14].mxu1 }
 0x27a   :  { %v523_v46 = vadd.f32 %v522_v40, %v521_v38  ;;  %v488_v47 = vpop.f32.mrb[15].mxu1  ;;  %v497_v56 = vadd.f32 %v1879_v42, %v373_v48  ;;  %v528_v60 = vsel %vm500_vm2, %v494_v49, 0.0 }
 0x27b   :  { %v524_v50 = vsel %vm500_vm2, %v486_v41, 0.0  ;;  %v489_v52 = vadd.f32 %v488_v47, %v373_v48 }
 0x27c   :  { %v525_v53 = vadd.f32 %v524_v50, %v523_v46  ;;  %v530_v62 = vsel %vm500_vm2, %v497_v56, 0.0 }
 0x27d   :  { %v526_v58 = vsel %vm500_vm2, %v489_v52, 0.0 }
 0x27e   :  { %v527_v59 = vadd.f32 %v526_v58, %v525_v53 }
 0x280   :  { %v529_v61 = vadd.f32 %v528_v60, %v527_v59 }
 0x282   :  { %v531_v63 = vadd.f32 %v530_v62, %v529_v61 }
 0x284   :  { %v532_v0 = vrot.slane %v531_v63, 4 }
 0x286   :  { %v533_v2 = vadd.f32 %v532_v0, %v531_v63 }
 0x288   :  { %v534_v3 = vrot.slane %v533_v2, 2 }
 0x28a   :  { %v535_v5 = vadd.f32 %v534_v3, %v533_v2 }
 0x28c   :  { %v536_v7 = vrot.slane %v535_v5, 1 }
 0x28e   :  { %v537_v16 = vadd.f32 %v536_v7, %v535_v5 }
 0x290   :  { %v539_v18 = vmul.f32 0.0078125, %v537_v16 }
 0x292   :  { %v540_v48 = vmul.f32 %v539_v18, %v2491_v45 }
 0x294   :  { %v544_v20 = vrot.slane %v540_v48, %v543_v19 }
 0x296   :  { %v2529_v21 = vsub.f32 %v2496_v51, %v544_v20  ;;  %v2532_v22 = vsub.f32 %v2500_v55, %v544_v20  ;;  %v2535_v23 = vsub.f32 %v2498_v54, %v544_v20  ;;  %v2538_v24 = vsub.f32 %v2504_v57, %v544_v20 }
 0x297   :  { %v2540_v26 = vsub.f32 %v454_v1, %v544_v20  ;;  %v2542_v27 = vsub.f32 %v457_v8, %v544_v20  ;;  %v2544_v28 = vsub.f32 %v462_v6, %v544_v20  ;;  %v2546_v30 = vsub.f32 %v465_v17, %v544_v20 }
 0x298   :  { %v2548_v32 = vsub.f32 %v470_v25, %v544_v20  ;;  %v2550_v51 = vsub.f32 %v473_v31, %v544_v20  ;;  %v2552_v55 = vsub.f32 %v478_v29, %v544_v20  ;;  %v2554_v34 = vsub.f32 %v481_v33, %v544_v20 }
 0x299   :  { %v2556_v54 = vsub.f32 %v486_v41, %v544_v20  ;;  %v2558_v57 = vsub.f32 %v489_v52, %v544_v20  ;;  %v2560_v1 = vsub.f32 %v494_v49, %v544_v20  ;;  %v2562_v8 = vsub.f32 %v497_v56, %v544_v20 }
 0x29a   :  { %v561_v6 = vmul.f32 %v2529_v21, %v2529_v21  ;;  %v562_v17 = vmul.f32 %v2532_v22, %v2532_v22  ;;  %v563_v25 = vmul.f32 %v2535_v23, %v2535_v23  ;;  %v564_v29 = vmul.f32 %v2538_v24, %v2538_v24 }
 0x29b   :  { %v565_v36 = vmul.f32 %v2540_v26, %v2540_v26  ;;  %v566_v39 = vmul.f32 %v2542_v27, %v2542_v27  ;;  %v567_v42 = vmul.f32 %v2544_v28, %v2544_v28  ;;  %v568_v49 = vmul.f32 %v2546_v30, %v2546_v30 }
 0x29c   :  { %v577_v31 = vsel %vm500_vm2, %v561_v6, 0.0  ;;  %v578_v33 = vsel %vm500_vm2, %v562_v17, 0.0  ;;  %v580_v37 = vsel %vm500_vm2, %v563_v25, 0.0  ;;  %v582_v40 = vsel %vm500_vm2, %v564_v29, 0.0 }
 0x29d   :  { %v579_v35 = vadd.f32 %v578_v33, %v577_v31  ;;  %v584_v46 = vsel %vm500_vm2, %v565_v36, 0.0  ;;  %v586_v50 = vsel %vm500_vm2, %v566_v39, 0.0  ;;  %v569_v53 = vmul.f32 %v2548_v32, %v2548_v32 }
 0x29e   :  { %v588_v56 = vsel %vm500_vm2, %v567_v42, 0.0  ;;  %v570_v59 = vmul.f32 %v2550_v51, %v2550_v51  ;;  %v590_v60 = vsel %vm500_vm2, %v568_v49, 0.0  ;;  %v571_v62 = vmul.f32 %v2552_v55, %v2552_v55 }
 0x29f   :  { %v581_v38 = vadd.f32 %v580_v37, %v579_v35  ;;  %v592_v63 = vsel %vm500_vm2, %v569_v53, 0.0  ;;  %v572_v2 = vmul.f32 %v2554_v34, %v2554_v34  ;;  %v573_v7 = vmul.f32 %v2556_v54, %v2556_v54 }
 0x2a0   :  { %v594_v3 = vsel %vm500_vm2, %v570_v59, 0.0  ;;  %v596_v16 = vsel %vm500_vm2, %v571_v62, 0.0  ;;  %v574_v48 = vmul.f32 %v2558_v57, %v2558_v57  ;;  %v575_v17 = vmul.f32 %v2560_v1, %v2560_v1 }
 0x2a1   :  { %v583_v41 = vadd.f32 %v582_v40, %v581_v38  ;;  %v598_v20 = vsel %vm500_vm2, %v572_v2, 0.0  ;;  %v600_v25 = vsel %vm500_vm2, %v573_v7, 0.0  ;;  %v576_v31 = vmul.f32 %v2562_v8, %v2562_v8 }
 0x2a2   :  { %v602_v33 = vsel %vm500_vm2, %v574_v48, 0.0  ;;  %v604_v36 = vsel %vm500_vm2, %v575_v17, 0.0  ;;  %v617_v53 = vsub.s32 1, %v2488_v43 }
 0x2a3   :  { %v585_v47 = vadd.f32 %v584_v46, %v583_v41  ;;  %v606_v38 = vsel %vm500_vm2, %v576_v31, 0.0 }
 0x2a5   :  { %v587_v52 = vadd.f32 %v586_v50, %v585_v47 }
 0x2a7   :  { %v589_v58 = vadd.f32 %v588_v56, %v587_v52  ;;  %v655_v56 = vsub.s32 2, %v2488_v43 }
 0x2a9   :  { %v591_v61 = vadd.f32 %v590_v60, %v589_v58  ;;  %v618_v58 = vrot.slane %v2491_v45, %v617_v53  ;;  %v2620_v59 = vrot.slane %v2491_v45, %v655_v56 }
 0x2ab   :  { %v593_v0 = vadd.f32 %v592_v63, %v591_v61  ;;  %v632_v60 = vmul.f32 %v618_v58, %v2558_v57  ;;  %v619_v61 = vmul.f32 %v618_v58, %v2529_v21  ;;  %v620_v62 = vmul.f32 %v618_v58, %v2532_v22 }
 0x2ac   :  { %v621_v63 = vmul.f32 %v618_v58, %v2535_v23  ;;  %v623_v2 = vmul.f32 %v618_v58, %v2540_v26  ;;  %v626_v7 = vmul.f32 %v618_v58, %v2546_v30  ;;  %v628_v57 = vmul.f32 %v618_v58, %v2550_v51 }
 0x2ad   :  { %v595_v5 = vadd.f32 %v594_v3, %v593_v0  ;;  %v622_v0 = vmul.f32 %v618_v58, %v2538_v24  ;;  %v624_v3 = vmul.f32 %v618_v58, %v2542_v27  ;;  %v629_v21 = vmul.f32 %v618_v58, %v2552_v55 }
 0x2ae   :  { %v630_v22 = vmul.f32 %v618_v58, %v2554_v34  ;;  %v631_v23 = vmul.f32 %v618_v58, %v2556_v54  ;;  %v633_v24 = vmul.f32 %v618_v58, %v2560_v1  ;;  %v634_v26 = vmul.f32 %v618_v58, %v2562_v8 }
 0x2af   :  { %v597_v18 = vadd.f32 %v596_v16, %v595_v5  ;;  %v625_v5 = vmul.f32 %v618_v58, %v2544_v28  ;;  %v627_v16 = vmul.f32 %v618_v58, %v2548_v32 }
 0x2b1   :  { %v599_v6 = vadd.f32 %v598_v20, %v597_v18 }
 0x2b3   :  { %v601_v29 = vadd.f32 %v600_v25, %v599_v6 }
 0x2b5   :  { %v603_v35 = vadd.f32 %v602_v33, %v601_v29 }
 0x2b7   :  { %v605_v37 = vadd.f32 %v604_v36, %v603_v35 }
 0x2b9   :  { %v607_v39 = vadd.f32 %v606_v38, %v605_v37 }
 0x2bb   :  { %v608_v40 = vrot.slane %v607_v39, 4 }
 0x2bd   :  { %v609_v41 = vadd.f32 %v608_v40, %v607_v39 }
 0x2bf   :  { %v610_v42 = vrot.slane %v609_v41, 2 }
 0x2c1   :  { %v611_v46 = vadd.f32 %v610_v42, %v609_v41 }
 0x2c3   :  { %v612_v47 = vrot.slane %v611_v46, 1 }
 0x2c5   :  { %v613_v49 = vadd.f32 %v612_v47, %v611_v46 }
 0x2c7   :  { %v614_v50 = vmul.f32 0.0078125, %v613_v49 }
 0x2c9   :  { %v635_v52 = vadd.f32 1e-05, %v614_v50 }
 0x2cb   :  { %2050 = vrsqrt.f32 %v635_v52 }
 0x2d5   :  { %v2051_v18 = vpop.eup %2050 }
 0x2d6   :  { %v650_v27 = vmul.f32 %v2051_v18, %v632_v60  ;;  %v637_v48 = vmul.f32 %v2051_v18, %v619_v61  ;;  %v638_v28 = vmul.f32 %v2051_v18, %v620_v62  ;;  %v639_v20 = vmul.f32 %v2051_v18, %v621_v63 }
 0x2d7   :  { %v640_v30 = vmul.f32 %v2051_v18, %v622_v0  ;;  %v641_v6 = vmul.f32 %v2051_v18, %v623_v2  ;;  %v642_v32 = vmul.f32 %v2051_v18, %v624_v3  ;;  %v643_v17 = vmul.f32 %v2051_v18, %v625_v5 }
 0x2d8   :  { %v670_v51 = vadd.f32 %v2620_v59, %v650_v27  ;;  %v657_v55 = vadd.f32 %v2620_v59, %v637_v48  ;;  %v658_v34 = vadd.f32 %v2620_v59, %v638_v28  ;;  %v659_v54 = vadd.f32 %v2620_v59, %v639_v20 }
 0x2d9   :  { %v660_v1 = vadd.f32 %v2620_v59, %v640_v30  ;;  %v661_v8 = vadd.f32 %v2620_v59, %v641_v6  ;;  %v662_v25 = vadd.f32 %v2620_v59, %v642_v32  ;;  %v644_v29 = vmul.f32 %v2051_v18, %v626_v7 }
 0x2da   :  { %v686_v31 = vmax.f32 %v670_v51, 0.0  ;;  %v673_v33 = vmax.f32 %v657_v55, 0.0  ;;  %v674_v35 = vmax.f32 %v658_v34, 0.0  ;;  %v675_v36 = vmax.f32 %v659_v54, 0.0 }
 0x2db   :  { %v676_v37 = vmax.f32 %v660_v1, 0.0  ;;  %v677_v38 = vmax.f32 %v661_v8, 0.0  ;;  %v678_v39 = vmax.f32 %v662_v25, 0.0  ;;  %v663_v40 = vadd.f32 %v2620_v59, %v643_v17 }
 0x2dc   :  { %v689_v41 = vpack.c.bf16 %v674_v35, %v673_v33  ;;  %v664_v42 = vadd.f32 %v2620_v59, %v644_v29  ;;  %v645_v46 = vmul.f32 %v2051_v18, %v627_v16  ;;  %v646_v47 = vmul.f32 %v2051_v18, %v628_v57 }
 0x2dd   :  { %v690_v49 = vpack.c.bf16 %v676_v37, %v675_v36  ;;  %v691_v50 = vpack.c.bf16 %v678_v39, %v677_v38  ;;  %v679_v52 = vmax.f32 %v663_v40, 0.0  ;;  %v647_v58 = vmul.f32 %v2051_v18, %v629_v21 }
 0x2de   :  { %1884 = vmatprep.mubr.msk.bf16.mxu1 %vm500_vm2, %v689_v41  ;;  %v680_v60 = vmax.f32 %v664_v42, 0.0  ;;  %v665_v61 = vadd.f32 %v2620_v59, %v645_v46  ;;  %v666_v62 = vadd.f32 %v2620_v59, %v646_v47  ;;  %v648_v63 = vmul.f32 %v2051_v18, %v630_v22 }
 0x2df   :  { %1885 = vmatmul.mubr.msk.bf16.vlgmr.msra.gmra.mrb[16].mxu1 %vm500_vm2, %v690_v49  ;;  %v667_v0 = vadd.f32 %v2620_v59, %v647_v58  ;;  %v649_v2 = vmul.f32 %v2051_v18, %v631_v23  ;;  %v651_v3 = vmul.f32 %v2051_v18, %v633_v24  ;;  %v652_v5 = vmul.f32 %v2051_v18, %v634_v26  ;;  %v2046_v58 = vld [vmem:[#allocation10 + $0x10] sm:$0xff]  }
 0x2e0   :  { %1888 = vmatprep.mubr.msk.bf16.mxu1 %vm500_vm2, %v691_v50  ;;  %v692_v7 = vpack.c.bf16 %v680_v60, %v679_v52  ;;  %v681_v16 = vmax.f32 %v665_v61, 0.0  ;;  %v682_v57 = vmax.f32 %v666_v62, 0.0  ;;  %v668_v21 = vadd.f32 %v2620_v59, %v648_v63  ;;  %v2047_v60 = vld [vmem:[#allocation10 + $0x18] sm:$0xff]   ;;  %1932 = vmatprep.subr.bf16.mxu1 %v2046_v58 }
 0x2e1   :  { %v683_v27 = vmax.f32 %v667_v0, 0.0  ;;  %v669_v48 = vadd.f32 %v2620_v59, %v649_v2  ;;  %v671_v28 = vadd.f32 %v2620_v59, %v651_v3  ;;  %v672_v22 = vadd.f32 %v2620_v59, %v652_v5  ;;  %1933 = vmatpush3.bf16.msra.mxu1 %v2046_v58 }
 0x2e2   :  { %v693_v20 = vpack.c.bf16 %v682_v57, %v681_v16  ;;  %v684_v30 = vmax.f32 %v668_v21, 0.0  ;;  %v844_v52 = vsub.s32 4, %v2488_v43  ;;  %1934 = vmatprep.subr.bf16.mxu1 %v2047_v60 }
 0x2e3   :  { %v685_v6 = vmax.f32 %v669_v48, 0.0  ;;  %v687_v23 = vmax.f32 %v671_v28, 0.0  ;;  %v688_v24 = vmax.f32 %v672_v22, 0.0 }
 0x2e4   :  { %v694_v18 = vpack.c.bf16 %v684_v30, %v683_v27 }
 0x2e5   :  { %v695_v26 = vpack.c.bf16 %v686_v31, %v685_v6  ;;  %v696_v32 = vpack.c.bf16 %v688_v24, %v687_v23  ;;  %1935 = vmatpush3.bf16.msra.mxu1 %v2047_v60 }
 0x2e7   :  { %1889 = vmatmul.mubr.msk.bf16.gmra.mrb[20].mxu1 %vm500_vm2, %v692_v7 }
 0x2e8   :  { %1892 = vmatprep.mubr.msk.bf16.mxu1 %vm500_vm2, %v693_v20 }
 0x2ef   :  { %1893 = vmatmul.mubr.msk.bf16.gmra.mrb[24].mxu1 %vm500_vm2, %v694_v18 }
 0x2f0   :  { %1896 = vmatprep.mubr.msk.bf16.mxu1 %vm500_vm2, %v695_v26 }
 0x2f7   :  { %1897 = vmatmul.mubr.msk.bf16.gmra.mrb[28].mxu1 %vm500_vm2, %v696_v32 }
 0x3b2   :  { %v1886_v17 = vpop.f32.mrb[16].mxu1 }
 0x3b3   :  { %v771_v59 = vpop.f32.mrb[17].mxu1 }
 0x3b4   :  { %v1887_v51 = vpop.f32.mrb[18].mxu1 }
 0x3b5   :  { %v835_v55 = vpack.c.bf16 %v1887_v51, %v1886_v17  ;;  %v774_v34 = vpop.f32.mrb[19].mxu1 }
 0x3b6   :  { %v834_v54 = vpack.c.bf16 %v774_v34, %v771_v59 }
 0x3b8   :  { %1900 = vmatprep.subr.bf16.mxu0 %v834_v54 }
 0x3b9   :  { %1901 = vmatpush3.bf16.msra.mxu0 %v834_v54 }
 0x3ba   :  { %v1890_v1 = vpop.f32.mrb[20].mxu1  ;;  %1902 = vmatprep.subr.bf16.mxu0 %v835_v55 }
 0x3bb   :  { %v787_v8 = vpop.f32.mrb[21].mxu1 }
 0x3bc   :  { %v1891_v25 = vpop.f32.mrb[22].mxu1 }
 0x3bd   :  { %v837_v29 = vpack.c.bf16 %v1891_v25, %v1890_v1  ;;  %v790_v31 = vpop.f32.mrb[23].mxu1  ;;  %1903 = vmatpush3.bf16.msra.mxu0 %v835_v55 }
 0x3be   :  { %v836_v33 = vpack.c.bf16 %v790_v31, %v787_v8 }
 0x3c0   :  { %1904 = vmatprep.subr.bf16.mxu0 %v836_v33 }
 0x3c1   :  { %1905 = vmatpush3.bf16.msra.mxu0 %v836_v33 }
 0x3c2   :  { %v1894_v35 = vpop.f32.mrb[24].mxu1  ;;  %1906 = vmatprep.subr.bf16.mxu0 %v837_v29 }
 0x3c3   :  { %v803_v36 = vpop.f32.mrb[25].mxu1 }
 0x3c4   :  { %v1895_v37 = vpop.f32.mrb[26].mxu1 }
 0x3c5   :  { %v839_v38 = vpack.c.bf16 %v1895_v37, %v1894_v35  ;;  %v806_v39 = vpop.f32.mrb[27].mxu1  ;;  %1907 = vmatpush3.bf16.msra.mxu0 %v837_v29 }
 0x3c6   :  { %v838_v40 = vpack.c.bf16 %v806_v39, %v803_v36 }
 0x3c8   :  { %1908 = vmatprep.subr.bf16.mxu0 %v838_v40 }
 0x3c9   :  { %1909 = vmatpush3.bf16.msra.mxu0 %v838_v40 }
 0x3ca   :  { %v1898_v41 = vpop.f32.mrb[28].mxu1  ;;  %1910 = vmatprep.subr.bf16.mxu0 %v839_v38 }
 0x3cb   :  { %v819_v42 = vpop.f32.mrb[29].mxu1 }
 0x3cc   :  { %v1899_v46 = vpop.f32.mrb[30].mxu1 }
 0x3cd   :  { %v841_v47 = vpack.c.bf16 %v1899_v46, %v1898_v41  ;;  %v822_v49 = vpop.f32.mrb[31].mxu1  ;;  %1911 = vmatpush3.bf16.msra.mxu0 %v839_v38 }
 0x3ce   :  { %v840_v50 = vpack.c.bf16 %v822_v49, %v819_v42 }
 0x3d0   :  { %1912 = vmatprep.subr.bf16.mxu0 %v840_v50 }
 0x3d1   :  { %1913 = vmatpush3.bf16.msra.mxu0 %v840_v50 }
 0x3d2   :  { %1914 = vmatprep.subr.bf16.mxu0 %v841_v47 }
 0x3d5   :  { %1915 = vmatpush3.bf16.msra.mxu0 %v841_v47 }
 0x3d8   :  { %1917 = vmatmul.mubr.bf16.vlgmr.msra.gmra.mrb[16].mxu0 %v2458_v9  ;;  %v845_v9 = vrot.slane %v2491_v45, %v844_v52 }
 0x3d9   :  { %1920 = vmatprep.mubr.bf16.mxu0 %v2460_v10 }
 0x3e0   :  { %1921 = vmatmul.mubr.bf16.gmra.mrb[20].mxu0 %v2464_v11 }
 0x3e1   :  { %1924 = vmatprep.mubr.bf16.mxu0 %v2466_v12 }
 0x3e8   :  { %1925 = vmatmul.mubr.bf16.gmra.mrb[24].mxu0 %v2470_v13 }
 0x3e9   :  { %1928 = vmatprep.mubr.bf16.mxu0 %v2472_v14 }
 0x3f0   :  { %1929 = vmatmul.mubr.bf16.gmra.mrb[28].mxu0 %v2476_v15 }
 0x3f1   :  { %1968 = vmatprep.mubr.bf16.mxu0 %v2455_v4 }
 0x4ab   :  { %v1918_v10 = vpop.f32.mrb[16].mxu0 }
 0x4ac   :  { %v880_v11 = vpop.f32.mrb[17].mxu0  ;;  %v2674_v14 = vadd.f32 %v1918_v10, %v845_v9 }
 0x4ad   :  { %v2672_v12 = vadd.f32 %v880_v11, %v845_v9  ;;  %v1919_v13 = vpop.f32.mrb[18].mxu0 }
 0x4ae   :  { %v883_v61 = vpop.f32.mrb[19].mxu0  ;;  %v2680_v62 = vadd.f32 %v1919_v13, %v845_v9  ;;  %v946_v2 = vsel %vm500_vm2, %v2674_v14, 0.0 }
 0x4af   :  { %v2676_v15 = vadd.f32 %v883_v61, %v845_v9  ;;  %v943_v4 = vsel %vm500_vm2, %v2672_v12, 0.0 }
 0x4b0   :  { %v948_v16 = vsel %vm500_vm2, %v2680_v62, 0.0 }
 0x4b1   :  { %v944_v63 = vsel %vm500_vm2, %v2676_v15, 0.0 }
 0x4b2   :  { %v945_v0 = vadd.f32 %v944_v63, %v943_v4 }
 0x4b3   :  { %v1922_v3 = vpop.f32.mrb[20].mxu0 }
 0x4b4   :  { %v947_v5 = vadd.f32 %v946_v2, %v945_v0  ;;  %v896_v7 = vpop.f32.mrb[21].mxu0  ;;  %v905_v28 = vadd.f32 %v1922_v3, %v845_v9 }
 0x4b5   :  { %v897_v57 = vadd.f32 %v896_v7, %v845_v9  ;;  %v1923_v21 = vpop.f32.mrb[22].mxu0 }
 0x4b6   :  { %v949_v27 = vadd.f32 %v948_v16, %v947_v5  ;;  %v899_v48 = vpop.f32.mrb[23].mxu0  ;;  %v908_v6 = vadd.f32 %v1923_v21, %v845_v9  ;;  %v954_v18 = vsel %vm500_vm2, %v905_v28, 0.0 }
 0x4b7   :  { %v950_v22 = vsel %vm500_vm2, %v897_v57, 0.0  ;;  %v900_v20 = vadd.f32 %v899_v48, %v845_v9 }
 0x4b8   :  { %v951_v30 = vadd.f32 %v950_v22, %v949_v27  ;;  %v956_v59 = vsel %vm500_vm2, %v908_v6, 0.0  ;;  %v984_v27 = vsub.s32 7, %v2488_v43 }
 0x4b9   :  { %v952_v23 = vsel %vm500_vm2, %v900_v20, 0.0 }
 0x4ba   :  { %v953_v24 = vadd.f32 %v952_v23, %v951_v30 }
 0x4bb   :  { %v1926_v26 = vpop.f32.mrb[24].mxu0 }
 0x4bc   :  { %v955_v32 = vadd.f32 %v954_v18, %v953_v24  ;;  %v912_v17 = vpop.f32.mrb[25].mxu0  ;;  %v921_v1 = vadd.f32 %v1926_v26, %v845_v9 }
 0x4bd   :  { %v913_v51 = vadd.f32 %v912_v17, %v845_v9  ;;  %v1927_v55 = vpop.f32.mrb[26].mxu0 }
 0x4be   :  { %v957_v34 = vadd.f32 %v956_v59, %v955_v32  ;;  %v915_v54 = vpop.f32.mrb[27].mxu0  ;;  %v924_v31 = vadd.f32 %v1927_v55, %v845_v9  ;;  %v962_v36 = vsel %vm500_vm2, %v921_v1, 0.0 }
 0x4bf   :  { %v958_v8 = vsel %vm500_vm2, %v913_v51, 0.0  ;;  %v916_v25 = vadd.f32 %v915_v54, %v845_v9 }
 0x4c0   :  { %v959_v29 = vadd.f32 %v958_v8, %v957_v34  ;;  %v964_v40 = vsel %vm500_vm2, %v924_v31, 0.0 }
 0x4c1   :  { %v960_v33 = vsel %vm500_vm2, %v916_v25, 0.0 }
 0x4c2   :  { %v961_v35 = vadd.f32 %v960_v33, %v959_v29 }
 0x4c3   :  { %v1930_v37 = vpop.f32.mrb[28].mxu0 }
 0x4c4   :  { %v963_v38 = vadd.f32 %v962_v36, %v961_v35  ;;  %v928_v39 = vpop.f32.mrb[29].mxu0  ;;  %v937_v49 = vadd.f32 %v1930_v37, %v845_v9 }
 0x4c5   :  { %v929_v41 = vadd.f32 %v928_v39, %v845_v9  ;;  %v1931_v42 = vpop.f32.mrb[30].mxu0 }
 0x4c6   :  { %v965_v46 = vadd.f32 %v964_v40, %v963_v38  ;;  %v931_v47 = vpop.f32.mrb[31].mxu0  ;;  %v940_v60 = vadd.f32 %v1931_v42, %v845_v9  ;;  %v970_v13 = vsel %vm500_vm2, %v937_v49, 0.0 }
 0x4c7   :  { %v966_v50 = vsel %vm500_vm2, %v929_v41, 0.0  ;;  %v932_v52 = vadd.f32 %v931_v47, %v845_v9 }
 0x4c8   :  { %v967_v58 = vadd.f32 %v966_v50, %v965_v46  ;;  %v972_v4 = vsel %vm500_vm2, %v940_v60, 0.0 }
 0x4c9   :  { %v968_v10 = vsel %vm500_vm2, %v932_v52, 0.0 }
 0x4ca   :  { %v969_v11 = vadd.f32 %v968_v10, %v967_v58 }
 0x4cc   :  { %v971_v61 = vadd.f32 %v970_v13, %v969_v11 }
 0x4ce   :  { %v973_v63 = vadd.f32 %v972_v4, %v971_v61 }
 0x4d0   :  { %v974_v0 = vrot.slane %v973_v63, 4 }
 0x4d2   :  { %v975_v2 = vadd.f32 %v974_v0, %v973_v63 }
 0x4d4   :  { %v976_v3 = vrot.slane %v975_v2, 2 }
 0x4d6   :  { %v977_v5 = vadd.f32 %v976_v3, %v975_v2 }
 0x4d8   :  { %v978_v7 = vrot.slane %v977_v5, 1 }
 0x4da   :  { %v979_v16 = vadd.f32 %v978_v7, %v977_v5 }
 0x4dc   :  { %v980_v21 = vmul.f32 0.0078125, %v979_v16 }
 0x4de   :  { %v981_v9 = vmul.f32 %v980_v21, %v2491_v45 }
 0x4e0   :  { %v985_v48 = vrot.slane %v981_v9, %v984_v27 }
 0x4e2   :  { %v2703_v22 = vsub.f32 %v2672_v12, %v985_v48  ;;  %v2706_v30 = vsub.f32 %v2676_v15, %v985_v48  ;;  %v2709_v23 = vsub.f32 %v2674_v14, %v985_v48  ;;  %v2712_v24 = vsub.f32 %v2680_v62, %v985_v48 }
 0x4e3   :  { %v2714_v18 = vsub.f32 %v897_v57, %v985_v48  ;;  %v2716_v26 = vsub.f32 %v900_v20, %v985_v48  ;;  %v2718_v32 = vsub.f32 %v905_v28, %v985_v48  ;;  %v2720_v17 = vsub.f32 %v908_v6, %v985_v48 }
 0x4e4   :  { %v2722_v59 = vsub.f32 %v913_v51, %v985_v48  ;;  %v2724_v12 = vsub.f32 %v916_v25, %v985_v48  ;;  %v2726_v15 = vsub.f32 %v921_v1, %v985_v48  ;;  %v2728_v55 = vsub.f32 %v924_v31, %v985_v48 }
 0x4e5   :  { %v2730_v14 = vsub.f32 %v929_v41, %v985_v48  ;;  %v2732_v62 = vsub.f32 %v932_v52, %v985_v48  ;;  %v2734_v57 = vsub.f32 %v937_v49, %v985_v48  ;;  %v2736_v20 = vsub.f32 %v940_v60, %v985_v48 }
 0x4e6   :  { %v1002_v28 = vmul.f32 %v2703_v22, %v2703_v22  ;;  %v1003_v6 = vmul.f32 %v2706_v30, %v2706_v30  ;;  %v1004_v51 = vmul.f32 %v2709_v23, %v2709_v23  ;;  %v1005_v34 = vmul.f32 %v2712_v24, %v2712_v24 }
 0x4e7   :  { %v1006_v25 = vmul.f32 %v2714_v18, %v2714_v18  ;;  %v1007_v33 = vmul.f32 %v2716_v26, %v2716_v26  ;;  %v1008_v37 = vmul.f32 %v2718_v32, %v2718_v32  ;;  %v1009_v40 = vmul.f32 %v2720_v17, %v2720_v17 }
 0x4e8   :  { %v1018_v54 = vsel %vm500_vm2, %v1002_v28, 0.0  ;;  %v1019_v1 = vsel %vm500_vm2, %v1003_v6, 0.0  ;;  %v1021_v29 = vsel %vm500_vm2, %v1004_v51, 0.0  ;;  %v1023_v35 = vsel %vm500_vm2, %v1005_v34, 0.0 }
 0x4e9   :  { %v1020_v8 = vadd.f32 %v1019_v1, %v1018_v54  ;;  %v1025_v38 = vsel %vm500_vm2, %v1006_v25, 0.0  ;;  %v1027_v41 = vsel %vm500_vm2, %v1007_v33, 0.0  ;;  %v1010_v46 = vmul.f32 %v2722_v59, %v2722_v59 }
 0x4ea   :  { %v1029_v47 = vsel %vm500_vm2, %v1008_v37, 0.0  ;;  %v1011_v50 = vmul.f32 %v2724_v12, %v2724_v12  ;;  %v1031_v52 = vsel %vm500_vm2, %v1009_v40, 0.0  ;;  %v1012_v60 = vmul.f32 %v2726_v15, %v2726_v15 }
 0x4eb   :  { %v1022_v31 = vadd.f32 %v1021_v29, %v1020_v8  ;;  %v1033_v10 = vsel %vm500_vm2, %v1010_v46, 0.0  ;;  %v1013_v13 = vmul.f32 %v2728_v55, %v2728_v55  ;;  %v1014_v63 = vmul.f32 %v2730_v14, %v2730_v14 }
 0x4ec   :  { %v1035_v61 = vsel %vm500_vm2, %v1011_v50, 0.0  ;;  %v1037_v0 = vsel %vm500_vm2, %v1012_v60, 0.0  ;;  %v1015_v3 = vmul.f32 %v2732_v62, %v2732_v62  ;;  %v1016_v16 = vmul.f32 %v2734_v57, %v2734_v57 }
 0x4ed   :  { %v1024_v36 = vadd.f32 %v1023_v35, %v1022_v31  ;;  %v1039_v5 = vsel %vm500_vm2, %v1013_v13, 0.0  ;;  %v1041_v21 = vsel %vm500_vm2, %v1014_v63, 0.0  ;;  %v1017_v9 = vmul.f32 %v2736_v20, %v2736_v20 }
 0x4ee   :  { %v1043_v48 = vsel %vm500_vm2, %v1015_v3, 0.0  ;;  %v1045_v6 = vsel %vm500_vm2, %v1016_v16, 0.0  ;;  %v1058_v37 = vsub.s32 5, %v2488_v43 }
 0x4ef   :  { %v1026_v39 = vadd.f32 %v1025_v38, %v1024_v36  ;;  %v1047_v34 = vsel %vm500_vm2, %v1017_v9, 0.0  ;;  %v1096_v38 = vsub.s32 6, %v2488_v43 }
 0x4f1   :  { %v1028_v42 = vadd.f32 %v1027_v41, %v1026_v39  ;;  %v1059_v39 = vrot.slane %v2491_v45, %v1058_v37  ;;  %v2790_v40 = vrot.slane %v2491_v45, %v1096_v38 }
 0x4f3   :  { %v1030_v49 = vadd.f32 %v1029_v47, %v1028_v42  ;;  %v1073_v41 = vmul.f32 %v1059_v39, %v2732_v62  ;;  %v1060_v42 = vmul.f32 %v1059_v39, %v2703_v22  ;;  %v1061_v46 = vmul.f32 %v1059_v39, %v2706_v30 }
 0x4f4   :  { %v1062_v47 = vmul.f32 %v1059_v39, %v2709_v23  ;;  %v1064_v50 = vmul.f32 %v1059_v39, %v2714_v18  ;;  %v1067_v60 = vmul.f32 %v1059_v39, %v2720_v17  ;;  %v1068_v45 = vmul.f32 %v1059_v39, %v2722_v59 }
 0x4f5   :  { %v1032_v58 = vadd.f32 %v1031_v52, %v1030_v49  ;;  %v1063_v49 = vmul.f32 %v1059_v39, %v2712_v24  ;;  %v1065_v52 = vmul.f32 %v1059_v39, %v2716_v26  ;;  %v1069_v62 = vmul.f32 %v1059_v39, %v2724_v12 }
 0x4f6   :  { %v1070_v22 = vmul.f32 %v1059_v39, %v2726_v15  ;;  %v1071_v30 = vmul.f32 %v1059_v39, %v2728_v55  ;;  %v1072_v23 = vmul.f32 %v1059_v39, %v2730_v14  ;;  %v1074_v24 = vmul.f32 %v1059_v39, %v2734_v57 }
 0x4f7   :  { %v1034_v11 = vadd.f32 %v1033_v10, %v1032_v58  ;;  %v1066_v58 = vmul.f32 %v1059_v39, %v2718_v32  ;;  %v1075_v18 = vmul.f32 %v1059_v39, %v2736_v20 }
 0x4f9   :  { %v1036_v4 = vadd.f32 %v1035_v61, %v1034_v11 }
 0x4fb   :  { %v1038_v2 = vadd.f32 %v1037_v0, %v1036_v4 }
 0x4fd   :  { %v1040_v7 = vadd.f32 %v1039_v5, %v1038_v2 }
 0x4ff   :  { %v1042_v27 = vadd.f32 %v1041_v21, %v1040_v7 }
 0x501   :  { %v1044_v28 = vadd.f32 %v1043_v48, %v1042_v27 }
 0x503   :  { %v1046_v51 = vadd.f32 %v1045_v6, %v1044_v28 }
 0x505   :  { %v1048_v54 = vadd.f32 %v1047_v34, %v1046_v51 }
 0x507   :  { %v1049_v1 = vrot.slane %v1048_v54, 4 }
 0x509   :  { %v1050_v8 = vadd.f32 %v1049_v1, %v1048_v54 }
 0x50b   :  { %v1051_v25 = vrot.slane %v1050_v8, 2 }
 0x50d   :  { %v1052_v29 = vadd.f32 %v1051_v25, %v1050_v8 }
 0x50f   :  { %v1053_v31 = vrot.slane %v1052_v29, 1 }
 0x511   :  { %v1054_v33 = vadd.f32 %v1053_v31, %v1052_v29 }
 0x513   :  { %v1055_v35 = vmul.f32 0.0078125, %v1054_v33 }
 0x515   :  { %v1076_v36 = vadd.f32 1e-05, %v1055_v35 }
 0x517   :  { %2052 = vrsqrt.f32 %v1076_v36 }
 0x521   :  { %v2053_v10 = vpop.eup %2052 }
 0x522   :  { %v1091_v26 = vmul.f32 %v2053_v10, %v1073_v41  ;;  %v1078_v11 = vmul.f32 %v2053_v10, %v1060_v42  ;;  %v1079_v32 = vmul.f32 %v2053_v10, %v1061_v46  ;;  %v1080_v13 = vmul.f32 %v2053_v10, %v1062_v47 }
 0x523   :  { %v1081_v17 = vmul.f32 %v2053_v10, %v1063_v49  ;;  %v1082_v61 = vmul.f32 %v2053_v10, %v1064_v50  ;;  %v1083_v59 = vmul.f32 %v2053_v10, %v1065_v52  ;;  %v1084_v4 = vmul.f32 %v2053_v10, %v1066_v58 }
 0x524   :  { %v1111_v12 = vadd.f32 %v2790_v40, %v1091_v26  ;;  %v1098_v15 = vadd.f32 %v2790_v40, %v1078_v11  ;;  %v1099_v55 = vadd.f32 %v2790_v40, %v1079_v32  ;;  %v1100_v14 = vadd.f32 %v2790_v40, %v1080_v13 }
 0x525   :  { %v1101_v57 = vadd.f32 %v2790_v40, %v1081_v17  ;;  %v1102_v20 = vadd.f32 %v2790_v40, %v1082_v61  ;;  %v1103_v63 = vadd.f32 %v2790_v40, %v1083_v59  ;;  %v1085_v0 = vmul.f32 %v2053_v10, %v1067_v60 }
 0x526   :  { %v1127_v2 = vmax.f32 %v1111_v12, 0.0  ;;  %v1114_v3 = vmax.f32 %v1098_v15, 0.0  ;;  %v1115_v5 = vmax.f32 %v1099_v55, 0.0  ;;  %v1116_v7 = vmax.f32 %v1100_v14, 0.0 }
 0x527   :  { %v1117_v16 = vmax.f32 %v1101_v57, 0.0  ;;  %v1118_v21 = vmax.f32 %v1102_v20, 0.0  ;;  %v1119_v27 = vmax.f32 %v1103_v63, 0.0  ;;  %v1104_v9 = vadd.f32 %v2790_v40, %v1084_v4 }
 0x528   :  { %v1130_v48 = vpack.c.bf16 %v1115_v5, %v1114_v3  ;;  %v1105_v28 = vadd.f32 %v2790_v40, %v1085_v0  ;;  %v1086_v6 = vmul.f32 %v2053_v10, %v1068_v45  ;;  %v1087_v51 = vmul.f32 %v2053_v10, %v1069_v62 }
 0x529   :  { %v1131_v34 = vpack.c.bf16 %v1117_v16, %v1116_v7  ;;  %v1132_v54 = vpack.c.bf16 %v1119_v27, %v1118_v21  ;;  %v1120_v1 = vmax.f32 %v1104_v9, 0.0  ;;  %v1088_v8 = vmul.f32 %v2053_v10, %v1070_v22  ;;  %v2056_v21 = vld [vmem:[#allocation2 + $0x8] sm:$0xff]   ;;  %v2057_v27 = vld [vmem:[#allocation2 + $0x10] sm:$0xff]   ;;  %v2058_v9 = vld [vmem:[#allocation2 + $0x18] sm:$0xff]  }
 0x52a   :  { %1936 = vmatprep.mubr.msk.bf16.mxu1 %vm500_vm2, %v1130_v48  ;;  %v1121_v25 = vmax.f32 %v1105_v28, 0.0  ;;  %v1106_v29 = vadd.f32 %v2790_v40, %v1086_v6  ;;  %v1107_v31 = vadd.f32 %v2790_v40, %v1087_v51  ;;  %v1089_v33 = vmul.f32 %v2053_v10, %v1071_v30  ;;  %v2059_v48 = vld [vmem:[#allocation2 + $0x20] sm:$0xff]   ;;  %v2060_v28 = vld [vmem:[#allocation2 + $0x28] sm:$0xff]   ;;  %v2061_v6 = vld [vmem:[#allocation2 + $0x30] sm:$0xff]  }
 0x52b   :  { %1937 = vmatmul.mubr.msk.bf16.vlgmr.msra.gmra.mrb[32].mxu1 %vm500_vm2, %v1131_v34  ;;  %v1108_v35 = vadd.f32 %v2790_v40, %v1088_v8  ;;  %v1090_v36 = vmul.f32 %v2053_v10, %v1072_v23  ;;  %v1092_v37 = vmul.f32 %v2053_v10, %v1074_v24  ;;  %v1093_v38 = vmul.f32 %v2053_v10, %v1075_v18  ;;  %v2062_v51 = vld [vmem:[#allocation2 + $0x38] sm:$0xff]   ;;  %v2832_v34 = vld [vmem:[#allocation13 + $0x8] sm:$0xf] }
 0x52c   :  { %1940 = vmatprep.mubr.msk.bf16.mxu1 %vm500_vm2, %v1132_v54  ;;  %v1133_v39 = vpack.c.bf16 %v1121_v25, %v1120_v1  ;;  %v1122_v41 = vmax.f32 %v1106_v29, 0.0  ;;  %v1123_v42 = vmax.f32 %v1107_v31, 0.0  ;;  %v1109_v46 = vadd.f32 %v2790_v40, %v1089_v33 }
 0x52d   :  { %v1124_v47 = vmax.f32 %v1108_v35, 0.0  ;;  %v1110_v49 = vadd.f32 %v2790_v40, %v1090_v36  ;;  %v1112_v50 = vadd.f32 %v2790_v40, %v1092_v37  ;;  %v1113_v52 = vadd.f32 %v2790_v40, %v1093_v38 }
 0x52e   :  { %v1134_v58 = vpack.c.bf16 %v1123_v42, %v1122_v41  ;;  %v1125_v60 = vmax.f32 %v1109_v46, 0.0  ;;  %v2285_v54 = vmov 0.0   ;;  %v1287_v1 = vrot.slane %v2832_v34, %v372_v44 }
 0x52f   :  { %v1126_v45 = vmax.f32 %v1110_v49, 0.0  ;;  %v1128_v62 = vmax.f32 %v1112_v50, 0.0  ;;  %v1129_v22 = vmax.f32 %v1113_v52, 0.0  ;;  %1984 = vmatprep.subr.bf16.mxu1 %v2285_v54 }
 0x530   :  { %v1135_v10 = vpack.c.bf16 %v1125_v60, %v1124_v47 }
 0x531   :  { %v1136_v30 = vpack.c.bf16 %v1127_v2, %v1126_v45  ;;  %v1137_v23 = vpack.c.bf16 %v1129_v22, %v1128_v62 }
 0x533   :  { %1941 = vmatmul.mubr.msk.bf16.gmra.mrb[36].mxu1 %vm500_vm2, %v1133_v39 }
 0x534   :  { %1944 = vmatprep.mubr.msk.bf16.mxu1 %vm500_vm2, %v1134_v58 }
 0x53b   :  { %1945 = vmatmul.mubr.msk.bf16.gmra.mrb[40].mxu1 %vm500_vm2, %v1135_v10 }
 0x53c   :  { %1948 = vmatprep.mubr.msk.bf16.mxu1 %vm500_vm2, %v1136_v30 }
 0x543   :  { %1949 = vmatmul.mubr.msk.bf16.gmra.mrb[44].mxu1 %vm500_vm2, %v1137_v23 }
 0x544   :  { %2000 = vmatprep.mubr.msk.bf16.mxu1 %vm2286_vm3, %v2285_v54 }
 0x5fe   :  { %v1938_v24 = vpop.f32.mrb[32].mxu1 }
 0x5ff   :  { %v1213_v40 = vpop.f32.mrb[33].mxu1 }
 0x600   :  { %v1939_v18 = vpop.f32.mrb[34].mxu1 }
 0x601   :  { %v1277_v26 = vpack.c.bf16 %v1939_v18, %v1938_v24  ;;  %v1216_v11 = vpop.f32.mrb[35].mxu1 }
 0x602   :  { %v1276_v32 = vpack.c.bf16 %v1216_v11, %v1213_v40 }
 0x604   :  { %1952 = vmatprep.subr.bf16.mxu0 %v1276_v32 }
 0x605   :  { %1953 = vmatpush3.bf16.msra.mxu0 %v1276_v32 }
 0x606   :  { %v1942_v13 = vpop.f32.mrb[36].mxu1  ;;  %1954 = vmatprep.subr.bf16.mxu0 %v1277_v26 }
 0x607   :  { %v1229_v17 = vpop.f32.mrb[37].mxu1 }
 0x608   :  { %v1943_v61 = vpop.f32.mrb[38].mxu1 }
 0x609   :  { %v1279_v59 = vpack.c.bf16 %v1943_v61, %v1942_v13  ;;  %v1232_v4 = vpop.f32.mrb[39].mxu1  ;;  %1955 = vmatpush3.bf16.msra.mxu0 %v1277_v26 }
 0x60a   :  { %v1278_v12 = vpack.c.bf16 %v1232_v4, %v1229_v17 }
 0x60c   :  { %1956 = vmatprep.subr.bf16.mxu0 %v1278_v12 }
 0x60d   :  { %1957 = vmatpush3.bf16.msra.mxu0 %v1278_v12 }
 0x60e   :  { %v1946_v15 = vpop.f32.mrb[40].mxu1  ;;  %1958 = vmatprep.subr.bf16.mxu0 %v1279_v59 }
 0x60f   :  { %v1245_v55 = vpop.f32.mrb[41].mxu1 }
 0x610   :  { %v1947_v14 = vpop.f32.mrb[42].mxu1 }
 0x611   :  { %v1281_v57 = vpack.c.bf16 %v1947_v14, %v1946_v15  ;;  %v1248_v20 = vpop.f32.mrb[43].mxu1  ;;  %1959 = vmatpush3.bf16.msra.mxu0 %v1279_v59 }
 0x612   :  { %v1280_v63 = vpack.c.bf16 %v1248_v20, %v1245_v55 }
 0x614   :  { %1960 = vmatprep.subr.bf16.mxu0 %v1280_v63 }
 0x615   :  { %1961 = vmatpush3.bf16.msra.mxu0 %v1280_v63 }
 0x616   :  { %v1950_v0 = vpop.f32.mrb[44].mxu1  ;;  %1962 = vmatprep.subr.bf16.mxu0 %v1281_v57 }
 0x617   :  { %v1261_v2 = vpop.f32.mrb[45].mxu1 }
 0x618   :  { %v1951_v3 = vpop.f32.mrb[46].mxu1 }
 0x619   :  { %v1283_v5 = vpack.c.bf16 %v1951_v3, %v1950_v0  ;;  %v1264_v7 = vpop.f32.mrb[47].mxu1  ;;  %1963 = vmatpush3.bf16.msra.mxu0 %v1281_v57 }
 0x61a   :  { %v1282_v16 = vpack.c.bf16 %v1264_v7, %v1261_v2 }
 0x61c   :  { %1964 = vmatprep.subr.bf16.mxu0 %v1282_v16 }
 0x61d   :  { %1965 = vmatpush3.bf16.msra.mxu0 %v1282_v16 }
 0x61e   :  { %1966 = vmatprep.subr.bf16.mxu0 %v1283_v5 }
 0x621   :  { %1967 = vmatpush3.bf16.msra.mxu0 %v1283_v5 }
 0x624   :  { %1969 = vmatmul.mubr.bf16.vlgmr.msra.gmra.mrb[32].mxu0 %v2056_v21 }
 0x625   :  { %1972 = vmatprep.mubr.bf16.mxu0 %v2057_v27 }
 0x62c   :  { %1973 = vmatmul.mubr.bf16.gmra.mrb[36].mxu0 %v2058_v9 }
 0x62d   :  { %1976 = vmatprep.mubr.bf16.mxu0 %v2059_v48 }
 0x634   :  { %1977 = vmatmul.mubr.bf16.gmra.mrb[40].mxu0 %v2060_v28 }
 0x635   :  { %1980 = vmatprep.mubr.bf16.mxu0 %v2061_v6 }
 0x63c   :  { %1981 = vmatmul.mubr.bf16.gmra.mrb[44].mxu0 %v2062_v51 }
 0x6f7   :  { %v1970_v8 = vpop.f32.mrb[32].mxu0 }
 0x6f8   :  { %v1322_v25 = vpop.f32.mrb[33].mxu0  ;;  %v2840_v35 = vadd.f32 %v1970_v8, %v1287_v1 }
 0x6f9   :  { %v2838_v29 = vadd.f32 %v1322_v25, %v1287_v1  ;;  %v1971_v31 = vpop.f32.mrb[34].mxu0 }
 0x6fa   :  { %v1325_v33 = vpop.f32.mrb[35].mxu0  ;;  %v2846_v38 = vadd.f32 %v1971_v31, %v1287_v1  ;;  %v1388_v44 = vsel %vm500_vm2, %v2840_v35, 0.0 }
 0x6fb   :  { %v2842_v36 = vadd.f32 %v1325_v33, %v1287_v1  ;;  %v1385_v37 = vsel %vm500_vm2, %v2838_v29, 0.0 }
 0x6fc   :  { %v1390_v49 = vsel %vm500_vm2, %v2846_v38, 0.0 }
 0x6fd   :  { %v1386_v39 = vsel %vm500_vm2, %v2842_v36, 0.0 }
 0x6fe   :  { %v1387_v41 = vadd.f32 %v1386_v39, %v1385_v37 }
 0x6ff   :  { %v1974_v42 = vpop.f32.mrb[36].mxu0 }
 0x700   :  { %v1389_v46 = vadd.f32 %v1388_v44, %v1387_v41  ;;  %v1338_v47 = vpop.f32.mrb[37].mxu0  ;;  %v1347_v45 = vadd.f32 %v1974_v42, %v1287_v1 }
 0x701   :  { %v1339_v50 = vadd.f32 %v1338_v47, %v1287_v1  ;;  %v1975_v52 = vpop.f32.mrb[38].mxu0 }
 0x702   :  { %v1391_v58 = vadd.f32 %v1390_v49, %v1389_v46  ;;  %v1341_v60 = vpop.f32.mrb[39].mxu0  ;;  %v1350_v30 = vadd.f32 %v1975_v52, %v1287_v1  ;;  %v1396_v40 = vsel %vm500_vm2, %v1347_v45, 0.0 }
 0x703   :  { %v1392_v62 = vsel %vm500_vm2, %v1339_v50, 0.0  ;;  %v1342_v22 = vadd.f32 %v1341_v60, %v1287_v1 }
 0x704   :  { %v1393_v10 = vadd.f32 %v1392_v62, %v1391_v58  ;;  %v1398_v32 = vsel %vm500_vm2, %v1350_v30, 0.0 }
 0x705   :  { %v1394_v23 = vsel %vm500_vm2, %v1342_v22, 0.0 }
 0x706   :  { %v1395_v24 = vadd.f32 %v1394_v23, %v1393_v10 }
 0x707   :  { %v1978_v18 = vpop.f32.mrb[40].mxu0 }
 0x708   :  { %v1397_v26 = vadd.f32 %v1396_v40, %v1395_v24  ;;  %v1354_v11 = vpop.f32.mrb[41].mxu0  ;;  %v1363_v4 = vadd.f32 %v1978_v18, %v1287_v1 }
 0x709   :  { %v1355_v13 = vadd.f32 %v1354_v11, %v1287_v1  ;;  %v1979_v17 = vpop.f32.mrb[42].mxu0 }
 0x70a   :  { %v1399_v61 = vadd.f32 %v1398_v32, %v1397_v26  ;;  %v1357_v59 = vpop.f32.mrb[43].mxu0  ;;  %v1366_v14 = vadd.f32 %v1979_v17, %v1287_v1  ;;  %v1404_v63 = vsel %vm500_vm2, %v1363_v4, 0.0 }
 0x70b   :  { %v1400_v12 = vsel %vm500_vm2, %v1355_v13, 0.0  ;;  %v1358_v15 = vadd.f32 %v1357_v59, %v1287_v1 }
 0x70c   :  { %v1401_v55 = vadd.f32 %v1400_v12, %v1399_v61  ;;  %v1406_v5 = vsel %vm500_vm2, %v1366_v14, 0.0 }
 0x70d   :  { %v1402_v57 = vsel %vm500_vm2, %v1358_v15, 0.0 }
 0x70e   :  { %v1403_v20 = vadd.f32 %v1402_v57, %v1401_v55 }
 0x70f   :  { %v1982_v0 = vpop.f32.mrb[44].mxu0 }
 0x710   :  { %v1405_v2 = vadd.f32 %v1404_v63, %v1403_v20  ;;  %v1370_v3 = vpop.f32.mrb[45].mxu0  ;;  %v1379_v9 = vadd.f32 %v1982_v0, %v1287_v1 }
 0x711   :  { %v1371_v7 = vadd.f32 %v1370_v3, %v1287_v1  ;;  %v1983_v16 = vpop.f32.mrb[46].mxu0 }
 0x712   :  { %v1407_v21 = vadd.f32 %v1406_v5, %v1405_v2  ;;  %v1373_v27 = vpop.f32.mrb[47].mxu0  ;;  %v1382_v51 = vadd.f32 %v1983_v16, %v1287_v1  ;;  %v1412_v31 = vsel %vm500_vm2, %v1379_v9, 0.0 }
 0x713   :  { %v1408_v48 = vsel %vm500_vm2, %v1371_v7, 0.0  ;;  %v1374_v28 = vadd.f32 %v1373_v27, %v1287_v1 }
 0x714   :  { %v1409_v6 = vadd.f32 %v1408_v48, %v1407_v21  ;;  %v1414_v37 = vsel %vm500_vm2, %v1382_v51, 0.0 }
 0x715   :  { %v1410_v8 = vsel %vm500_vm2, %v1374_v28, 0.0 }
 0x716   :  { %v1411_v25 = vadd.f32 %v1410_v8, %v1409_v6 }
 0x718   :  { %v1413_v33 = vadd.f32 %v1412_v31, %v1411_v25 }
 0x71a   :  { %v1415_v39 = vadd.f32 %v1414_v37, %v1413_v33 }
 0x71c   :  { %v1416_v41 = vrot.slane %v1415_v39, 4 }
 0x71e   :  { %v1417_v44 = vadd.f32 %v1416_v41, %v1415_v39 }
 0x720   :  { %v1418_v42 = vrot.slane %v1417_v44, 2 }
 0x722   :  { %v1419_v46 = vadd.f32 %v1418_v42, %v1417_v44 }
 0x724   :  { %v1420_v47 = vrot.slane %v1419_v46, 1 }
 0x726   :  { %v1421_v49 = vadd.f32 %v1420_v47, %v1419_v46 }
 0x728   :  { %v1422_v52 = vmul.f32 0.0078125, %v1421_v49 }
 0x72a   :  { %v1423_v58 = vmul.f32 %v1422_v52, %v2832_v34 }
 0x72c   :  { %v1427_v1 = vrot.slane %v1423_v58, %v543_v19 }
 0x72e   :  { %v2872_v60 = vsub.f32 %v2838_v29, %v1427_v1  ;;  %v2875_v62 = vsub.f32 %v2842_v36, %v1427_v1  ;;  %v2878_v10 = vsub.f32 %v2840_v35, %v1427_v1  ;;  %v2881_v23 = vsub.f32 %v2846_v38, %v1427_v1 }
 0x72f   :  { %v2883_v24 = vsub.f32 %v1339_v50, %v1427_v1  ;;  %v2885_v40 = vsub.f32 %v1342_v22, %v1427_v1  ;;  %v2887_v18 = vsub.f32 %v1347_v45, %v1427_v1  ;;  %v2889_v26 = vsub.f32 %v1350_v30, %v1427_v1 }
 0x730   :  { %v2891_v19 = vsub.f32 %v1355_v13, %v1427_v1  ;;  %v2893_v29 = vsub.f32 %v1358_v15, %v1427_v1  ;;  %v2895_v36 = vsub.f32 %v1363_v4, %v1427_v1  ;;  %v2897_v11 = vsub.f32 %v1366_v14, %v1427_v1 }
 0x731   :  { %v2899_v35 = vsub.f32 %v1371_v7, %v1427_v1  ;;  %v1441_v38 = vsub.f32 %v1374_v28, %v1427_v1  ;;  %v2901_v32 = vsub.f32 %v1379_v9, %v1427_v1  ;;  %v2903_v50 = vsub.f32 %v1382_v51, %v1427_v1 }
 0x732   :  { %v1444_v45 = vmul.f32 %v2872_v60, %v2872_v60  ;;  %v1445_v22 = vmul.f32 %v2875_v62, %v2875_v62  ;;  %v1446_v30 = vmul.f32 %v2878_v10, %v2878_v10  ;;  %v1447_v13 = vmul.f32 %v2881_v23, %v2881_v23 }
 0x733   :  { %v1448_v4 = vmul.f32 %v2883_v24, %v2883_v24  ;;  %v1449_v55 = vmul.f32 %v2885_v40, %v2885_v40  ;;  %v1450_v20 = vmul.f32 %v2887_v18, %v2887_v18  ;;  %v1451_v2 = vmul.f32 %v2889_v26, %v2889_v26 }
 0x734   :  { %v1460_v17 = vsel %vm500_vm2, %v1444_v45, 0.0  ;;  %v1461_v61 = vsel %vm500_vm2, %v1445_v22, 0.0  ;;  %v1463_v12 = vsel %vm500_vm2, %v1446_v30, 0.0  ;;  %v1465_v14 = vsel %vm500_vm2, %v1447_v13, 0.0 }
 0x735   :  { %v1462_v59 = vadd.f32 %v1461_v61, %v1460_v17  ;;  %v1467_v63 = vsel %vm500_vm2, %v1448_v4, 0.0  ;;  %v1469_v3 = vsel %vm500_vm2, %v1449_v55, 0.0  ;;  %v1452_v7 = vmul.f32 %v2891_v19, %v2891_v19 }
 0x736   :  { %v1471_v16 = vsel %vm500_vm2, %v1450_v20, 0.0  ;;  %v1453_v27 = vmul.f32 %v2893_v29, %v2893_v29  ;;  %v1473_v9 = vsel %vm500_vm2, %v1451_v2, 0.0  ;;  %v1454_v28 = vmul.f32 %v2895_v36, %v2895_v36 }
 0x737   :  { %v1464_v15 = vadd.f32 %v1463_v12, %v1462_v59  ;;  %v1475_v6 = vsel %vm500_vm2, %v1452_v7, 0.0  ;;  %v1455_v8 = vmul.f32 %v2897_v11, %v2897_v11  ;;  %v1456_v33 = vmul.f32 %v2899_v35, %v2899_v35 }
 0x738   :  { %v1477_v25 = vsel %vm500_vm2, %v1453_v27, 0.0  ;;  %v1479_v37 = vsel %vm500_vm2, %v1454_v28, 0.0  ;;  %v1457_v41 = vmul.f32 %v1441_v38, %v1441_v38  ;;  %v1458_v46 = vmul.f32 %v2901_v32, %v2901_v32 }
 0x739   :  { %v1466_v57 = vadd.f32 %v1465_v14, %v1464_v15  ;;  %v1481_v44 = vsel %vm500_vm2, %v1455_v8, 0.0  ;;  %v1483_v47 = vsel %vm500_vm2, %v1456_v33, 0.0  ;;  %v1459_v52 = vmul.f32 %v2903_v50, %v2903_v50 }
 0x73a   :  { %v1485_v58 = vsel %vm500_vm2, %v1457_v41, 0.0  ;;  %v1487_v45 = vsel %vm500_vm2, %v1458_v46, 0.0  ;;  %v1539_v20 = vrot.slane %v2832_v34, %v655_v56 }
 0x73b   :  { %v1468_v0 = vadd.f32 %v1467_v63, %v1466_v57  ;;  %v1489_v30 = vsel %vm500_vm2, %v1459_v52, 0.0  ;;  %v1501_v57 = vrot.slane %v2832_v34, %v617_v53 }
 0x73d   :  { %v1470_v5 = vadd.f32 %v1469_v3, %v1468_v0  ;;  %v1515_v63 = vmul.f32 %v1501_v57, %v1441_v38  ;;  %v1502_v0 = vmul.f32 %v1501_v57, %v2872_v60  ;;  %v1503_v2 = vmul.f32 %v1501_v57, %v2875_v62 }
 0x73e   :  { %v1504_v3 = vmul.f32 %v1501_v57, %v2878_v10  ;;  %v1506_v7 = vmul.f32 %v1501_v57, %v2883_v24  ;;  %v1509_v53 = vmul.f32 %v1501_v57, %v2889_v26  ;;  %v1510_v43 = vmul.f32 %v1501_v57, %v2891_v19 }
 0x73f   :  { %v1472_v21 = vadd.f32 %v1471_v16, %v1470_v5  ;;  %v1505_v5 = vmul.f32 %v1501_v57, %v2881_v23  ;;  %v1507_v16 = vmul.f32 %v1501_v57, %v2885_v40  ;;  %v1511_v56 = vmul.f32 %v1501_v57, %v2893_v29 }
 0x740   :  { %v1512_v34 = vmul.f32 %v1501_v57, %v2895_v36  ;;  %v1513_v62 = vmul.f32 %v1501_v57, %v2897_v11  ;;  %v1514_v10 = vmul.f32 %v1501_v57, %v2899_v35  ;;  %v1516_v23 = vmul.f32 %v1501_v57, %v2901_v32 }
 0x741   :  { %v1474_v48 = vadd.f32 %v1473_v9, %v1472_v21  ;;  %v1508_v21 = vmul.f32 %v1501_v57, %v2887_v18  ;;  %v1517_v24 = vmul.f32 %v1501_v57, %v2903_v50 }
 0x743   :  { %v1476_v51 = vadd.f32 %v1475_v6, %v1474_v48 }
 0x745   :  { %v1478_v31 = vadd.f32 %v1477_v25, %v1476_v51 }
 0x747   :  { %v1480_v39 = vadd.f32 %v1479_v37, %v1478_v31 }
 0x749   :  { %v1482_v42 = vadd.f32 %v1481_v44, %v1480_v39 }
 0x74b   :  { %v1484_v49 = vadd.f32 %v1483_v47, %v1482_v42 }
 0x74d   :  { %v1486_v1 = vadd.f32 %v1485_v58, %v1484_v49 }
 0x74f   :  { %v1488_v22 = vadd.f32 %v1487_v45, %v1486_v1 }
 0x751   :  { %v1490_v13 = vadd.f32 %v1489_v30, %v1488_v22 }
 0x753   :  { %v1491_v17 = vrot.slane %v1490_v13, 4 }
 0x755   :  { %v1492_v61 = vadd.f32 %v1491_v17, %v1490_v13 }
 0x757   :  { %v1493_v59 = vrot.slane %v1492_v61, 2 }
 0x759   :  { %v1494_v4 = vadd.f32 %v1493_v59, %v1492_v61 }
 0x75b   :  { %v1495_v12 = vrot.slane %v1494_v4, 1 }
 0x75d   :  { %v1496_v15 = vadd.f32 %v1495_v12, %v1494_v4  ;;  %v1556_v12 = vld [vmem:[#allocation5] sm:$0xf] }
 0x75f   :  { %v1497_v55 = vmul.f32 0.0078125, %v1496_v15  ;;  %v2048_v15 = vld [vmem:[#allocation11] sm:$0xff]  }
 0x761   :  { %v1518_v14 = vadd.f32 1e-05, %v1497_v55  ;;  %v2049_v55 = vld [vmem:[#allocation11 + $0x8] sm:$0xff]  }
 0x763   :  { %2054 = vrsqrt.f32 %v1518_v14 }
 0x76d   :  { %v2055_v60 = vpop.eup %2054 }
 0x76e   :  { %v1533_v40 = vmul.f32 %v2055_v60, %v1515_v63  ;;  %v1520_v38 = vmul.f32 %v2055_v60, %v1502_v0  ;;  %v1521_v18 = vmul.f32 %v2055_v60, %v1503_v2  ;;  %v1522_v27 = vmul.f32 %v2055_v60, %v1504_v3  ;;  %v1737_v2 = vld [vmem:[#allocation14] ss:$0 sm:$0xff] }
 0x76f   :  { %v1523_v26 = vmul.f32 %v2055_v60, %v1505_v5  ;;  %v1524_v9 = vmul.f32 %v2055_v60, %v1506_v7  ;;  %v1525_v19 = vmul.f32 %v2055_v60, %v1507_v16  ;;  %v1526_v48 = vmul.f32 %v2055_v60, %v1508_v21 }
 0x770   :  { %v1553_v29 = vadd.f32 %v1539_v20, %v1533_v40  ;;  %v1540_v28 = vadd.f32 %v1539_v20, %v1520_v38  ;;  %v1541_v36 = vadd.f32 %v1539_v20, %v1521_v18  ;;  %v1542_v6 = vadd.f32 %v1539_v20, %v1522_v27 }
 0x771   :  { %v1543_v51 = vadd.f32 %v1539_v20, %v1523_v26  ;;  %v1544_v11 = vadd.f32 %v1539_v20, %v1524_v9  ;;  %v1545_v8 = vadd.f32 %v1539_v20, %v1525_v19  ;;  %v1527_v35 = vmul.f32 %v2055_v60, %v1509_v53 }
 0x772   :  { %v1557_v25 = vpack.c.bf16 %v1541_v36, %v1540_v28  ;;  %v1546_v32 = vadd.f32 %v1539_v20, %v1526_v48  ;;  %v1528_v31 = vmul.f32 %v2055_v60, %v1510_v43  ;;  %v1529_v50 = vmul.f32 %v2055_v60, %v1511_v56 }
 0x773   :  { %v1558_v33 = vpack.c.bf16 %v1543_v51, %v1542_v6  ;;  %v1559_v37 = vpack.c.bf16 %v1545_v8, %v1544_v11  ;;  %v1547_v39 = vadd.f32 %v1539_v20, %v1527_v35  ;;  %v1530_v41 = vmul.f32 %v2055_v60, %v1512_v34 }
 0x774   :  { %1985 = vmatpush3.bf16.msra.mxu1 %v1557_v25  ;;  %v1548_v44 = vadd.f32 %v1539_v20, %v1528_v31  ;;  %v1549_v42 = vadd.f32 %v1539_v20, %v1529_v50  ;;  %v1531_v46 = vmul.f32 %v2055_v60, %v1513_v62  ;;  %v1532_v47 = vmul.f32 %v2055_v60, %v1514_v10 }
 0x775   :  { %1986 = vmatprep.subr.bf16.mxu1 %v2285_v54  ;;  %v1560_v49 = vpack.c.bf16 %v1547_v39, %v1546_v32  ;;  %v1550_v52 = vadd.f32 %v1539_v20, %v1530_v41  ;;  %v1534_v58 = vmul.f32 %v2055_v60, %v1516_v23  ;;  %v1535_v1 = vmul.f32 %v2055_v60, %v1517_v24 }
 0x776   :  { %v1561_v45 = vpack.c.bf16 %v1549_v42, %v1548_v44  ;;  %v1551_v22 = vadd.f32 %v1539_v20, %v1531_v46  ;;  %v1552_v30 = vadd.f32 %v1539_v20, %v1532_v47 }
 0x777   :  { %v1554_v13 = vadd.f32 %v1539_v20, %v1534_v58  ;;  %v1555_v17 = vadd.f32 %v1539_v20, %v1535_v1 }
 0x778   :  { %1987 = vmatpush3.bf16.msra.mxu1 %v1558_v33  ;;  %v1562_v61 = vpack.c.bf16 %v1551_v22, %v1550_v52  ;;  %v1563_v59 = vpack.c.bf16 %v1553_v29, %v1552_v30 }
 0x779   :  { %1988 = vmatprep.subr.bf16.mxu1 %v2285_v54  ;;  %v1564_v4 = vpack.c.bf16 %v1555_v17, %v1554_v13 }
 0x77c   :  { %1989 = vmatpush3.bf16.msra.mxu1 %v1559_v37 }
 0x77d   :  { %1990 = vmatprep.subr.bf16.mxu1 %v2285_v54 }
 0x780   :  { %1991 = vmatpush3.bf16.msra.mxu1 %v1560_v49 }
 0x781   :  { %1992 = vmatprep.subr.bf16.mxu1 %v2285_v54 }
 0x784   :  { %1993 = vmatpush3.bf16.msra.mxu1 %v1561_v45 }
 0x785   :  { %1994 = vmatprep.subr.bf16.mxu1 %v2285_v54 }
 0x788   :  { %1995 = vmatpush3.bf16.msra.mxu1 %v1562_v61 }
 0x789   :  { %1996 = vmatprep.subr.bf16.mxu1 %v2285_v54 }
 0x78c   :  { %1997 = vmatpush3.bf16.msra.mxu1 %v1563_v59 }
 0x78d   :  { %1998 = vmatprep.subr.bf16.mxu1 %v2285_v54 }
 0x790   :  { %1999 = vmatpush3.bf16.msra.mxu1 %v1564_v4 }
 0x791   :  { %2004 = vmatprep.subr.bf16.mxu1 %v2285_v54 }
 0x793   :  { %2001 = vmatmul.mubr.bf16.vlgmr.msra.gmra.mrb[48].mxu1 %v1556_v12 }
 0x794   :  { %2005 = vmatpush3.bf16.msra.mxu1 %v2048_v15  ;;  %2008 = vmatprep.mubr.msk.bf16.mxu1 %vm2286_vm3, %v2285_v54 }
 0x795   :  { %2006 = vmatprep.subr.bf16.mxu1 %v2285_v54 }
 0x798   :  { %2007 = vmatpush3.bf16.msra.mxu1 %v2049_v55 }
 0x866   :  { %v1599_v14 = vpop.f32.mrb[48].mxu1 }
 0x867   :  { %v1605_v57 = vpack.c.bf16 %v1599_v14, %v1599_v14  ;;  %v2002_v20 = vpop.f32.mrb[49].mxu1 }
 0x868   :  { %v1602_v63 = vpop.f32.mrb[50].mxu1 }
 0x869   :  { %v2003_v0 = vpop.f32.mrb[51].mxu1  ;;  %2009 = vmatmul.mubr.msk.bf16.vlgmr.msra.gmra.mrb[52].mxu1 %vm500_vm2, %v1605_v57 }
 0x93c   :  { %v1666_v3 = vpop.f32.mrb[52].mxu1 }
 0x93d   :  { %v1667_v5 = vadd.f32 %v1737_v2, %v1666_v3  ;;  %v2010_v7 = vpop.f32.mrb[53].mxu1 }
 0x93e   :  { %v1669_v16 = vpop.f32.mrb[54].mxu1 }
 0x93f   :  { %v2011_v21 = vpop.f32.mrb[55].mxu1  ;;  %1673 = vst.msk [vmem:[#allocation16] sm:$0xff] %vm1672_vm4, %v1667_v5 }
 0x940   :  { %2250 = shalt.err (!%p2247_p12)
}
 0x941   :  { %s2251_s9 = scalar_lea.hbm %s3004_s8, 128 }
 0x942   :  { %p2252_p13 = scmp.ne.s32.totalorder %s3004_s8, %s2251_s9  ;;  %p2255_p0 = scmp.lt.u32.totalorder %s2251_s9, %s3004_s8 }
 0x944   :  { %p2257_p1 = pnand %p2255_p0, %p2252_p13 }
 0x946   :  { %2260 = shalt.err (!%p2257_p1)
}
 0x947   :  { %1683 = dma.vmem_to_hbm [thread:$0]  %s1681_s2, 128, %s3004_s8, [#allocation4]  }
 0x948   :  { %2271 = dma.done.wait [#allocation4], 128  }
 0x949   :  { %2272 = vsyncadd [#allocation4], 4294967168 }
 0x94a   :  { %1687 = vsyncpa [#allocation3], 1 }
 0x94b   :  { %1688 = vsyncpa [#allocation6], 1 }
 0x94c   :  { %1689 = vsyncpa [#allocation9], 1 }
 0x94d   :  { %1690 = vsyncpa [#allocation12], 1 }
 0x94e   :  { %1691 = vsyncpa [#allocation15], 1 }
 0x94f   :  { %1692 = vsyncpa [#allocation4], 1 }

</bundles_post_ra>
